<compile_context>
chip_gen: v7x
topology: tpu7x:2x2x1
jax: 0.10.0
libtpu: 0.0.40
codegen_flags: <defaults>
</compile_context>

<pallas_src>
import functools

import jax
import jax.numpy as jnp
from jax.experimental import pallas as pl
from jax.experimental.pallas import tpu as pltpu

# Keep the pure-JAX reference matmuls at f32 accuracy (TPU default may be bf16).
jax.config.update("jax_default_matmul_precision", "highest")


# ----------------------------------------------------------------------------
# Tiling helpers
# ----------------------------------------------------------------------------
def _pick_spatial_tile(S, C, n_streams, bytes_per_elem=4, budget_bytes=24 << 20):
    """Largest multiple-of-128 divisor of S whose double-buffered streams fit.

    Falls back to the full extent S (always a legal block shape) when S has no
    suitable divisor (e.g. the rfft spatial size) or S < 128.
    """
    best = None
    for cand in range(128, S + 1, 128):
        if S % cand != 0:
            continue
        if n_streams * 2 * C * cand * bytes_per_elem <= budget_bytes:
            best = cand
    return best if best is not None else S


_COMPILER_PARAMS = pltpu.CompilerParams(
    dimension_semantics=("parallel", "parallel"),
    vmem_limit_bytes=48 * 1024 * 1024,
)


def _replicated_spec(arr):
    n = arr.ndim
    return pl.BlockSpec(arr.shape, lambda b, s, _n=n: (0,) * _n)


# ----------------------------------------------------------------------------
# Kernel 1: FourierBlock pointwise layer
#   conv1x1 -> LeakyReLU -> conv1x1 -> MultiHeadFreqAttention gating
# ----------------------------------------------------------------------------
def _fourier_pointwise_kernel(xf_ref, wa_ref, ba_ref, wb_ref, bb_ref,
                              w1h_ref, b1h_ref, w2h_ref, b2h_ref, sel_ref,
                              wm_ref, bm_ref, o_ref):
    x = xf_ref[0].astype(jnp.float32)                                  # (2C, tS)
    h1 = jax.nn.leaky_relu(
        jnp.dot(wa_ref[...], x, preferred_element_type=jnp.float32) + ba_ref[...])
    h2 = jnp.dot(wb_ref[...], h1, preferred_element_type=jnp.float32) + bb_ref[...]

    # Three attention heads: stacked first projections as one matmul.
    hh = jax.nn.leaky_relu(
        jnp.dot(w1h_ref[...], h2, preferred_element_type=jnp.float32) + b1h_ref[...])
    # 1-wide per-head second projection: VPU mul + per-head sum via 0/1 selector.
    prod = hh * w2h_ref[...]                                           # (3*Cr2, tS)
    heads = jnp.dot(sel_ref[...], prod, preferred_element_type=jnp.float32)  # (3, tS)
    a_heads = jax.nn.sigmoid(heads + b2h_ref[...])                     # (3, tS)
    a = jax.nn.sigmoid(
        jnp.sum(a_heads * wm_ref[...], axis=0, keepdims=True) + bm_ref[...])  # (1, tS)

    o_ref[0] = (h2 * a).astype(o_ref.dtype)


def fourier_pointwise_pallas(xf, wa, ba, wb, bb, w1h, b1h, w2h, b2h, wm, bm):
    """xf: (B, 2C, Sf) channels-as-sublanes, spatial-as-lanes."""
    B, C2, Sf = xf.shape
    n_heads = 3
    head_dim = w1h.shape[0] // n_heads
    sel = jnp.repeat(jnp.eye(n_heads, dtype=jnp.float32), head_dim, axis=1)

    tS = _pick_spatial_tile(Sf, C2, n_streams=2)
    grid = (B, Sf // tS)
    data_spec = pl.BlockSpec((1, C2, tS), lambda b, s: (b, 0, s))

    return pl.pallas_call(
        _fourier_pointwise_kernel,
        out_shape=jax.ShapeDtypeStruct((B, C2, Sf), xf.dtype),
        grid_spec=pltpu.PrefetchScalarGridSpec(
            num_scalar_prefetch=0,
            grid=grid,
            in_specs=[
                data_spec,
                _replicated_spec(wa), _replicated_spec(ba),
                _replicated_spec(wb), _replicated_spec(bb),
                _replicated_spec(w1h), _replicated_spec(b1h),
                _replicated_spec(w2h), _replicated_spec(b2h),
                _replicated_spec(sel),
                _replicated_spec(wm), _replicated_spec(bm),
            ],
            out_specs=data_spec,
        ),
        compiler_params=_COMPILER_PARAMS,
    )(xf, wa, ba, wb, bb, w1h, b1h, w2h, b2h, sel, wm, bm)


# ----------------------------------------------------------------------------
# Kernel 2: fused CALayer gating + SALayer + residual sum
#   z = sp * ca ; s = sigmoid(w2 . relu(W1 z + b1) + b2) ; out = spec + z*s + x
# ----------------------------------------------------------------------------
def _ca_sa_residual_kernel(sp_ref, x_ref, spec_ref, ca_ref,
                           w1_ref, b1_ref, w2_ref, b2_ref, o_ref):
    sp = sp_ref[0].astype(jnp.float32)                                 # (C, tS)
    z = sp * ca_ref[0]                                                 # CA gate (C,1)
    h = jnp.dot(w1_ref[...], z, preferred_element_type=jnp.float32) + b1_ref[...]
    h = jnp.maximum(h, 0.0)                                            # (Cr, tS)
    # 1-wide projection: VPU mul + sublane reduce (no MXU push).
    s = jax.nn.sigmoid(jnp.sum(h * w2_ref[...], axis=0, keepdims=True) + b2_ref[...])
    o_ref[0] = (spec_ref[0] + z * s + x_ref[0]).astype(o_ref.dtype)


def ca_sa_residual_pallas(out_spatial, x, out_spectral, ca_gate, w1, b1, w2, b2):
    """All big tensors are (B, C, S); ca_gate is (B, C, 1)."""
    B, C, S = out_spatial.shape
    tS = _pick_spatial_tile(S, C, n_streams=4)
    grid = (B, S // tS)
    data_spec = pl.BlockSpec((1, C, tS), lambda b, s: (b, 0, s))

    return pl.pallas_call(
        _ca_sa_residual_kernel,
        out_shape=jax.ShapeDtypeStruct((B, C, S), out_spatial.dtype),
        grid_spec=pltpu.PrefetchScalarGridSpec(
            num_scalar_prefetch=0,
            grid=grid,
            in_specs=[
                data_spec, data_spec, data_spec,
                pl.BlockSpec((1, C, 1), lambda b, s: (b, 0, 0)),
                _replicated_spec(w1), _replicated_spec(b1),
                _replicated_spec(w2), _replicated_spec(b2),
            ],
            out_specs=data_spec,
        ),
        compiler_params=_COMPILER_PARAMS,
    )(out_spatial, x, out_spectral, ca_gate, w1, b1, w2, b2)


# ----------------------------------------------------------------------------
# Glue (plain JAX): FFT, 3x3 convs, tiny CA pooling MLP
# ----------------------------------------------------------------------------
def _conv3x3(x, w, b):
    # TODO(synk): 3x3 convs left to XLA conv; a Pallas shifted-matmul version needs halo handling.
    y = jax.lax.conv_general_dilated(
        x, w, window_strides=(1, 1), padding=((1, 1), (1, 1)),
        dimension_numbers=("NCHW", "OIHW", "NCHW"))
    return y + b[None, :, None, None]


@functools.partial(jax.jit)
def basic_layer_pallas(x, p):
    B, C, H, W = x.shape

    # ---- spectral branch (FourierBlock) ----
    # TODO(synk): rfft2/irfft2 have no Pallas equivalent; done with jnp.fft (XLA FFT op).
    xft = jnp.fft.rfft2(x, axes=(-2, -1), norm="ortho")
    Wf = xft.shape[-1]
    xf = jnp.stack([xft.real, xft.imag], axis=2).reshape(B, 2 * C, H, Wf)
    xf2 = xf.reshape(B, 2 * C, H * Wf)                # free reshape, no transpose
    yf2 = fourier_pointwise_pallas(
        xf2, p["fa_w"], p["fa_b"], p["fb_w"], p["fb_b"],
        p["h1_w"], p["h1_b"], p["h2_w"], p["h2_b"], p["mh_w"], p["mh_b"])
    yf = yf2.reshape(B, C, 2, H, Wf)
    out_ft = yf[:, :, 0] + 1j * yf[:, :, 1]
    out_spectral = jnp.fft.irfft2(out_ft, axes=(-2, -1), norm="ortho")  # (B,C,H,W)

    # ---- spatial branch: conv3x3 -> LeakyReLU -> conv3x3 ----
    t = jax.nn.leaky_relu(_conv3x3(x, p["c1_w"], p["c1_b"]))
    sp = _conv3x3(t, p["c2_w"], p["c2_b"])

    # ---- CALayer gate (tiny (B,C) MLP stays in plain JAX) ----
    sp3 = sp.reshape(B, C, H * W)
    pooled = jnp.mean(sp3, axis=-1)                                     # (B, C)
    tca = jnp.maximum(pooled @ p["ca1_w"].T + p["ca1_b"], 0.0)
    ca = jax.nn.sigmoid(tca @ p["ca2_w"].T + p["ca2_b"])                # (B, C)
    ca_gate = ca[..., None].astype(jnp.float32)                         # (B, C, 1)

    # ---- fused CA gating + SALayer + residual sum (Pallas) ----
    out = ca_sa_residual_pallas(
        sp3, x.reshape(B, C, H * W), out_spectral.reshape(B, C, H * W),
        ca_gate, p["sa1_w"], p["sa1_b"], p["sa2_w"], p["sa2_b"])
    return out.reshape(B, C, H, W)


# ----------------------------------------------------------------------------
# Pure-JAX reference of the PyTorch BasicLayer forward
# ----------------------------------------------------------------------------
def basic_layer_ref(x, p):
    B, C, H, W = x.shape
    leaky = jax.nn.leaky_relu

    # FourierBlock
    xft = jnp.fft.rfft2(x, axes=(-2, -1), norm="ortho")
    Wf = xft.shape[-1]
    xf2 = jnp.stack([xft.real, xft.imag], axis=2).reshape(B, 2 * C, H * Wf)
    h1 = leaky(jnp.einsum("oi,bis->bos", p["fa_w"], xf2) + p["fa_b"][None])
    h2 = jnp.einsum("oi,bis->bos", p["fb_w"], h1) + p["fb_b"][None]
    hh = leaky(jnp.einsum("oi,bis->bos", p["h1_w"], h2) + p["h1_b"][None])
    cr2 = p["h1_w"].shape[0] // 3
    heads = (hh * p["h2_w"][None]).reshape(B, 3, cr2, H * Wf).sum(axis=2)
    a_heads = jax.nn.sigmoid(heads + p["h2_b"][None])
    a = jax.nn.sigmoid(jnp.sum(a_heads * p["mh_w"][None], axis=1, keepdims=True)
                       + p["mh_b"][None])
    yf = (h2 * a).reshape(B, C, 2, H, Wf)
    out_ft = yf[:, :, 0] + 1j * yf[:, :, 1]
    out_spectral = jnp.fft.irfft2(out_ft, axes=(-2, -1), norm="ortho")

    # spatial branch
    t = leaky(_conv3x3(x, p["c1_w"], p["c1_b"]))
    sp = _conv3x3(t, p["c2_w"], p["c2_b"])
    # CALayer
    pooled = jnp.mean(sp, axis=(-2, -1))
    tca = jnp.maximum(pooled @ p["ca1_w"].T + p["ca1_b"], 0.0)
    ca = jax.nn.sigmoid(tca @ p["ca2_w"].T + p["ca2_b"])
    z = sp * ca[:, :, None, None]
    # SALayer
    hs = jnp.maximum(jnp.einsum("oi,bihw->bohw", p["sa1_w"], z)
                     + p["sa1_b"][None, :, :, None], 0.0)
    s = jax.nn.sigmoid(jnp.einsum("oi,bihw->bohw", p["sa2_w"].T, hs)
                       + p["sa2_b"][:, :, None, None])
    out_spatial = z * s

    return out_spectral + out_spatial + x


# ----------------------------------------------------------------------------
# Parameter construction (deterministic synthetic weights, PyTorch-equivalent)
# ----------------------------------------------------------------------------
def init_params(key, channels):
    C = channels
    Cr = C // 8
    C2 = 2 * C
    Cr2 = C2 // 8
    ks = iter(jax.random.split(key, 22))

    def w(shape, scale=0.1):
        return (scale * jax.random.normal(next(ks), shape)).astype(jnp.float32)

    p = {}
    # FourierBlock.layer: two 1x1 convs (2C -> 2C), weights as (out, in)
    p["fa_w"], p["fa_b"] = w((C2, C2)), w((C2, 1), 0.05)
    p["fb_w"], p["fb_b"] = w((C2, C2)), w((C2, 1), 0.05)
    # MultiHeadFreqAttention: 3 heads stacked ((2C -> 2C//8), then (2C//8 -> 1))
    p["h1_w"], p["h1_b"] = w((3 * Cr2, C2)), w((3 * Cr2, 1), 0.05)
    p["h2_w"], p["h2_b"] = w((3 * Cr2, 1)), w((3, 1), 0.05)
    p["mh_w"], p["mh_b"] = w((3, 1)), w((1, 1), 0.05)
    # conv1 / conv2 (3x3, OIHW)
    p["c1_w"], p["c1_b"] = w((C, C, 3, 3)), w((C,), 0.05)
    p["c2_w"], p["c2_b"] = w((C, C, 3, 3)), w((C,), 0.05)
    # CALayer 1x1 convs
    p["ca1_w"], p["ca1_b"] = w((Cr, C)), w((Cr,), 0.05)
    p["ca2_w"], p["ca2_b"] = w((C, Cr)), w((C,), 0.05)
    # SALayer 1x1 convs
    p["sa1_w"], p["sa1_b"] = w((Cr, C)), w((Cr, 1), 0.05)
    p["sa2_w"], p["sa2_b"] = w((Cr, 1)), w((1, 1), 0.05)
    return p


if __name__ == "__main__":
    key = jax.random.PRNGKey(0)
    k_x, k_p = jax.random.split(key)

    # Small shapes consistent with BasicLayer (channels divisible by 8, even W).
    N, C, H, W = 2, 16, 16, 16
    x = jax.random.normal(k_x, (N, C, H, W), dtype=jnp.float32)
    params = init_params(k_p, C)

    out = basic_layer_pallas(x, params)
    out = jax.block_until_ready(out)

    ref = basic_layer_ref(x, params)
    assert out.shape == (N, C, H, W)
    max_err = float(jnp.max(jnp.abs(out - ref)))
    assert jnp.allclose(out, ref, atol=1e-4, rtol=1e-4), f"mismatch vs reference: {max_err}"

    print("KERNEL_OK")
</pallas_src>

<mosaic_0001>
module attributes {stable_mosaic.version = 11 : i64} {
  func.func @_fourier_pointwise_kernel(%arg0: i32, %arg1: i32, %arg2: memref<1x32x144xf32, #tpu.memory_space<vmem>>, %arg3: memref<32x32xf32, #tpu.memory_space<vmem>>, %arg4: memref<32x1xf32, #tpu.memory_space<vmem>>, %arg5: memref<32x32xf32, #tpu.memory_space<vmem>>, %arg6: memref<32x1xf32, #tpu.memory_space<vmem>>, %arg7: memref<12x32xf32, #tpu.memory_space<vmem>>, %arg8: memref<12x1xf32, #tpu.memory_space<vmem>>, %arg9: memref<12x1xf32, #tpu.memory_space<vmem>>, %arg10: memref<3x1xf32, #tpu.memory_space<vmem>>, %arg11: memref<3x12xf32, #tpu.memory_space<vmem>>, %arg12: memref<3x1xf32, #tpu.memory_space<vmem>>, %arg13: memref<1x1xf32, #tpu.memory_space<vmem>>, %arg14: memref<1x32x144xf32, #tpu.memory_space<vmem>>) attributes {dimension_semantics = [#tpu.dimension_semantics<parallel>, #tpu.dimension_semantics<parallel>], iteration_bounds = array<i64: 2, 1>, scalar_prefetch = 0 : i64, scratch_operands = 0 : i64, tpu.core_type = #tpu.core_type<tc>, window_params = [{transform_indices = @transform_0, window_bounds = array<i64: 1, 32, 144>}, {pipeline_mode = #tpu.pipeline_mode<synchronous>, transform_indices = @transform_1, window_bounds = array<i64: 32, 32>}, {pipeline_mode = #tpu.pipeline_mode<synchronous>, transform_indices = @transform_2, window_bounds = array<i64: 32, 1>}, {pipeline_mode = #tpu.pipeline_mode<synchronous>, transform_indices = @transform_3, window_bounds = array<i64: 32, 32>}, {pipeline_mode = #tpu.pipeline_mode<synchronous>, transform_indices = @transform_4, window_bounds = array<i64: 32, 1>}, {pipeline_mode = #tpu.pipeline_mode<synchronous>, transform_indices = @transform_5, window_bounds = array<i64: 12, 32>}, {pipeline_mode = #tpu.pipeline_mode<synchronous>, transform_indices = @transform_6, window_bounds = array<i64: 12, 1>}, {pipeline_mode = #tpu.pipeline_mode<synchronous>, transform_indices = @transform_7, window_bounds = array<i64: 12, 1>}, {pipeline_mode = #tpu.pipeline_mode<synchronous>, transform_indices = @transform_8, window_bounds = array<i64: 3, 1>}, {pipeline_mode = #tpu.pipeline_mode<synchronous>, transform_indices = @transform_9, window_bounds = array<i64: 3, 12>}, {pipeline_mode = #tpu.pipeline_mode<synchronous>, transform_indices = @transform_10, window_bounds = array<i64: 3, 1>}, {pipeline_mode = #tpu.pipeline_mode<synchronous>, transform_indices = @transform_11, window_bounds = array<i64: 1, 1>}, {transform_indices = @transform_12, window_bounds = array<i64: 1, 32, 144>}]} {
    %c0 = arith.constant 0 : index
    %c0_0 = arith.constant 0 : index
    %c0_1 = arith.constant 0 : index
    %0 = vector.load %arg2[%c0, %c0_0, %c0_1] : memref<1x32x144xf32, #tpu.memory_space<vmem>>, vector<1x32x144xf32>
    %1 = vector.shape_cast %0 : vector<1x32x144xf32> to vector<32x144xf32>
    %c0_2 = arith.constant 0 : index
    %c0_3 = arith.constant 0 : index
    %2 = vector.load %arg3[%c0_2, %c0_3] : memref<32x32xf32, #tpu.memory_space<vmem>>, vector<32x32xf32>
    %cst = arith.constant dense<0.000000e+00> : vector<32x144xf32>
    %3 = tpu.matmul %2, %1, %cst {dimension_numbers = #tpu.dot_dimension_numbers<[1], [0], [0], [1], [0, 0, 1, 1], [], []>, precision = #tpu.contract_precision<fp32>} : vector<32x32xf32>, vector<32x144xf32>, vector<32x144xf32> -> vector<32x144xf32>
    %c0_4 = arith.constant 0 : index
    %c0_5 = arith.constant 0 : index
    %4 = vector.load %arg4[%c0_4, %c0_5] : memref<32x1xf32, #tpu.memory_space<vmem>>, vector<32x1xf32>
    %5 = vector.broadcast %4 : vector<32x1xf32> to vector<32x144xf32>
    %6 = arith.addf %3, %5 : vector<32x144xf32>
    %cst_6 = arith.constant 0.000000e+00 : f32
    %7 = vector.broadcast %cst_6 : f32 to vector<32x144xf32>
    %8 = arith.cmpf oge, %6, %7 : vector<32x144xf32>
    %cst_7 = arith.constant 0.00999999977 : f32
    %9 = vector.broadcast %cst_7 : f32 to vector<32x144xf32>
    %10 = arith.mulf %9, %6 : vector<32x144xf32>
    %11 = arith.select %8, %6, %10 : vector<32x144xi1>, vector<32x144xf32>
    %c0_8 = arith.constant 0 : index
    %c0_9 = arith.constant 0 : index
    %12 = vector.load %arg5[%c0_8, %c0_9] : memref<32x32xf32, #tpu.memory_space<vmem>>, vector<32x32xf32>
    %cst_10 = arith.constant dense<0.000000e+00> : vector<32x144xf32>
    %13 = tpu.matmul %12, %11, %cst_10 {dimension_numbers = #tpu.dot_dimension_numbers<[1], [0], [0], [1], [0, 0, 1, 1], [], []>, precision = #tpu.contract_precision<fp32>} : vector<32x32xf32>, vector<32x144xf32>, vector<32x144xf32> -> vector<32x144xf32>
    %c0_11 = arith.constant 0 : index
    %c0_12 = arith.constant 0 : index
    %14 = vector.load %arg6[%c0_11, %c0_12] : memref<32x1xf32, #tpu.memory_space<vmem>>, vector<32x1xf32>
    %15 = vector.broadcast %14 : vector<32x1xf32> to vector<32x144xf32>
    %16 = arith.addf %13, %15 : vector<32x144xf32>
    %c0_13 = arith.constant 0 : index
    %c0_14 = arith.constant 0 : index
    %17 = vector.load %arg7[%c0_13, %c0_14] : memref<12x32xf32, #tpu.memory_space<vmem>>, vector<12x32xf32>
    %cst_15 = arith.constant dense<0.000000e+00> : vector<12x144xf32>
    %18 = tpu.matmul %17, %16, %cst_15 {dimension_numbers = #tpu.dot_dimension_numbers<[1], [0], [0], [1], [0, 0, 1, 1], [], []>, precision = #tpu.contract_precision<fp32>} : vector<12x32xf32>, vector<32x144xf32>, vector<12x144xf32> -> vector<12x144xf32>
    %c0_16 = arith.constant 0 : index
    %c0_17 = arith.constant 0 : index
    %19 = vector.load %arg8[%c0_16, %c0_17] : memref<12x1xf32, #tpu.memory_space<vmem>>, vector<12x1xf32>
    %20 = vector.broadcast %19 : vector<12x1xf32> to vector<12x144xf32>
    %21 = arith.addf %18, %20 : vector<12x144xf32>
    %cst_18 = arith.constant 0.000000e+00 : f32
    %22 = vector.broadcast %cst_18 : f32 to vector<12x144xf32>
    %23 = arith.cmpf oge, %21, %22 : vector<12x144xf32>
    %cst_19 = arith.constant 0.00999999977 : f32
    %24 = vector.broadcast %cst_19 : f32 to vector<12x144xf32>
    %25 = arith.mulf %24, %21 : vector<12x144xf32>
    %26 = arith.select %23, %21, %25 : vector<12x144xi1>, vector<12x144xf32>
    %c0_20 = arith.constant 0 : index
    %c0_21 = arith.constant 0 : index
    %27 = vector.load %arg9[%c0_20, %c0_21] : memref<12x1xf32, #tpu.memory_space<vmem>>, vector<12x1xf32>
    %28 = vector.broadcast %27 : vector<12x1xf32> to vector<12x144xf32>
    %29 = arith.mulf %26, %28 : vector<12x144xf32>
    %c0_22 = arith.constant 0 : index
    %c0_23 = arith.constant 0 : index
    %30 = vector.load %arg11[%c0_22, %c0_23] : memref<3x12xf32, #tpu.memory_space<vmem>>, vector<3x12xf32>
    %cst_24 = arith.constant dense<0.000000e+00> : vector<3x144xf32>
    %31 = tpu.matmul %30, %29, %cst_24 {dimension_numbers = #tpu.dot_dimension_numbers<[1], [0], [0], [1], [0, 0, 1, 1], [], []>, precision = #tpu.contract_precision<fp32>} : vector<3x12xf32>, vector<12x144xf32>, vector<3x144xf32> -> vector<3x144xf32>
    %c0_25 = arith.constant 0 : index
    %c0_26 = arith.constant 0 : index
    %32 = vector.load %arg10[%c0_25, %c0_26] : memref<3x1xf32, #tpu.memory_space<vmem>>, vector<3x1xf32>
    %33 = vector.broadcast %32 : vector<3x1xf32> to vector<3x144xf32>
    %34 = arith.addf %31, %33 : vector<3x144xf32>
    %35 = arith.negf %34 : vector<3x144xf32>
    %36 = math.exp %35 : vector<3x144xf32>
    %cst_27 = arith.constant 1.000000e+00 : f32
    %37 = vector.broadcast %cst_27 : f32 to vector<3x144xf32>
    %38 = arith.addf %37, %36 : vector<3x144xf32>
    %39 = arith.divf %37, %38 : vector<3x144xf32>
    %c0_28 = arith.constant 0 : index
    %c0_29 = arith.constant 0 : index
    %40 = vector.load %arg12[%c0_28, %c0_29] : memref<3x1xf32, #tpu.memory_space<vmem>>, vector<3x1xf32>
    %41 = vector.broadcast %40 : vector<3x1xf32> to vector<3x144xf32>
    %42 = arith.mulf %39, %41 : vector<3x144xf32>
    %cst_30 = arith.constant dense<0.000000e+00> : vector<144xf32>
    %43 = vector.multi_reduction <add>, %42, %cst_30 [0] : vector<3x144xf32> to vector<144xf32>
    %44 = vector.shape_cast %43 : vector<144xf32> to vector<1x144xf32>
    %c0_31 = arith.constant 0 : index
    %c0_32 = arith.constant 0 : index
    %45 = vector.load %arg13[%c0_31, %c0_32] : memref<1x1xf32, #tpu.memory_space<vmem>>, vector<1x1xf32>
    %46 = vector.broadcast %45 : vector<1x1xf32> to vector<1x144xf32>
    %47 = arith.addf %44, %46 : vector<1x144xf32>
    %48 = arith.negf %47 : vector<1x144xf32>
    %49 = math.exp %48 : vector<1x144xf32>
    %cst_33 = arith.constant 1.000000e+00 : f32
    %50 = vector.broadcast %cst_33 : f32 to vector<1x144xf32>
    %51 = arith.addf %50, %49 : vector<1x144xf32>
    %52 = arith.divf %50, %51 : vector<1x144xf32>
    %53 = vector.broadcast %52 : vector<1x144xf32> to vector<32x144xf32>
    %54 = arith.mulf %16, %53 : vector<32x144xf32>
    %c0_34 = arith.constant 0 : index
    %c0_35 = arith.constant 0 : index
    %c0_36 = arith.constant 0 : index
    %55 = vector.load %arg14[%c0_34, %c0_35, %c0_36] : memref<1x32x144xf32, #tpu.memory_space<vmem>>, vector<1x32x144xf32>
    %56 = vector.shape_cast %55 : vector<1x32x144xf32> to vector<32x144xf32>
    %57 = vector.shape_cast %54 : vector<32x144xf32> to vector<1x32x144xf32>
    tpu.vector_store %arg14[%c0_34, %c0_35, %c0_36], %57 {strides = array<i32>} : memref<1x32x144xf32, #tpu.memory_space<vmem>>, vector<1x32x144xf32>,
    return
  }
  func.func @transform_0(%arg0: i32, %arg1: i32) -> (i32, i32, i32) {
    %c0_i32 = arith.constant 0 : i32
    %c0_i32_0 = arith.constant 0 : i32
    return %arg0, %c0_i32, %arg1 : i32, i32, i32
  }
  func.func @transform_1(%arg0: i32, %arg1: i32) -> (i32, i32) {
    %c0_i32 = arith.constant 0 : i32
    %c0_i32_0 = arith.constant 0 : i32
    %c0_i32_1 = arith.constant 0 : i32
    return %c0_i32, %c0_i32_0 : i32, i32
  }
  func.func @transform_2(%arg0: i32, %arg1: i32) -> (i32, i32) {
    %c0_i32 = arith.constant 0 : i32
    %c0_i32_0 = arith.constant 0 : i32
    %c0_i32_1 = arith.constant 0 : i32
    return %c0_i32, %c0_i32_0 : i32, i32
  }
  func.func @transform_3(%arg0: i32, %arg1: i32) -> (i32, i32) {
    %c0_i32 = arith.constant 0 : i32
    %c0_i32_0 = arith.constant 0 : i32
    %c0_i32_1 = arith.constant 0 : i32
    return %c0_i32, %c0_i32_0 : i32, i32
  }
  func.func @transform_4(%arg0: i32, %arg1: i32) -> (i32, i32) {
    %c0_i32 = arith.constant 0 : i32
    %c0_i32_0 = arith.constant 0 : i32
    %c0_i32_1 = arith.constant 0 : i32
    return %c0_i32, %c0_i32_0 : i32, i32
  }
  func.func @transform_5(%arg0: i32, %arg1: i32) -> (i32, i32) {
    %c0_i32 = arith.constant 0 : i32
    %c0_i32_0 = arith.constant 0 : i32
    %c0_i32_1 = arith.constant 0 : i32
    return %c0_i32, %c0_i32_0 : i32, i32
  }
  func.func @transform_6(%arg0: i32, %arg1: i32) -> (i32, i32) {
    %c0_i32 = arith.constant 0 : i32
    %c0_i32_0 = arith.constant 0 : i32
    %c0_i32_1 = arith.constant 0 : i32
    return %c0_i32, %c0_i32_0 : i32, i32
  }
  func.func @transform_7(%arg0: i32, %arg1: i32) -> (i32, i32) {
    %c0_i32 = arith.constant 0 : i32
    %c0_i32_0 = arith.constant 0 : i32
    %c0_i32_1 = arith.constant 0 : i32
    return %c0_i32, %c0_i32_0 : i32, i32
  }
  func.func @transform_8(%arg0: i32, %arg1: i32) -> (i32, i32) {
    %c0_i32 = arith.constant 0 : i32
    %c0_i32_0 = arith.constant 0 : i32
    %c0_i32_1 = arith.constant 0 : i32
    return %c0_i32, %c0_i32_0 : i32, i32
  }
  func.func @transform_9(%arg0: i32, %arg1: i32) -> (i32, i32) {
    %c0_i32 = arith.constant 0 : i32
    %c0_i32_0 = arith.constant 0 : i32
    %c0_i32_1 = arith.constant 0 : i32
    return %c0_i32, %c0_i32_0 : i32, i32
  }
  func.func @transform_10(%arg0: i32, %arg1: i32) -> (i32, i32) {
    %c0_i32 = arith.constant 0 : i32
    %c0_i32_0 = arith.constant 0 : i32
    %c0_i32_1 = arith.constant 0 : i32
    return %c0_i32, %c0_i32_0 : i32, i32
  }
  func.func @transform_11(%arg0: i32, %arg1: i32) -> (i32, i32) {
    %c0_i32 = arith.constant 0 : i32
    %c0_i32_0 = arith.constant 0 : i32
    %c0_i32_1 = arith.constant 0 : i32
    return %c0_i32, %c0_i32_0 : i32, i32
  }
  func.func @transform_12(%arg0: i32, %arg1: i32) -> (i32, i32, i32) {
    %c0_i32 = arith.constant 0 : i32
    %c0_i32_0 = arith.constant 0 : i32
    return %arg0, %c0_i32, %arg1 : i32, i32, i32
  }
}

module attributes {stable_mosaic.version = 11 : i64} {
  func.func @_ca_sa_residual_kernel(%arg0: i32, %arg1: i32, %arg2: memref<1x16x256xf32, #tpu.memory_space<vmem>>, %arg3: memref<1x16x256xf32, #tpu.memory_space<vmem>>, %arg4: memref<1x16x256xf32, #tpu.memory_space<vmem>>, %arg5: memref<1x16x1xf32, #tpu.memory_space<vmem>>, %arg6: memref<2x16xf32, #tpu.memory_space<vmem>>, %arg7: memref<2x1xf32, #tpu.memory_space<vmem>>, %arg8: memref<2x1xf32, #tpu.memory_space<vmem>>, %arg9: memref<1x1xf32, #tpu.memory_space<vmem>>, %arg10: memref<1x16x256xf32, #tpu.memory_space<vmem>>) attributes {dimension_semantics = [#tpu.dimension_semantics<parallel>, #tpu.dimension_semantics<parallel>], iteration_bounds = array<i64: 2, 1>, scalar_prefetch = 0 : i64, scratch_operands = 0 : i64, tpu.core_type = #tpu.core_type<tc>, window_params = [{transform_indices = @transform_0, window_bounds = array<i64: 1, 16, 256>}, {transform_indices = @transform_1, window_bounds = array<i64: 1, 16, 256>}, {transform_indices = @transform_2, window_bounds = array<i64: 1, 16, 256>}, {transform_indices = @transform_3, window_bounds = array<i64: 1, 16, 1>}, {pipeline_mode = #tpu.pipeline_mode<synchronous>, transform_indices = @transform_4, window_bounds = array<i64: 2, 16>}, {pipeline_mode = #tpu.pipeline_mode<synchronous>, transform_indices = @transform_5, window_bounds = array<i64: 2, 1>}, {pipeline_mode = #tpu.pipeline_mode<synchronous>, transform_indices = @transform_6, window_bounds = array<i64: 2, 1>}, {pipeline_mode = #tpu.pipeline_mode<synchronous>, transform_indices = @transform_7, window_bounds = array<i64: 1, 1>}, {transform_indices = @transform_8, window_bounds = array<i64: 1, 16, 256>}]} {
    %c0 = arith.constant 0 : index
    %c0_0 = arith.constant 0 : index
    %c0_1 = arith.constant 0 : index
    %0 = vector.load %arg2[%c0, %c0_0, %c0_1] : memref<1x16x256xf32, #tpu.memory_space<vmem>>, vector<1x16x256xf32>
    %1 = vector.shape_cast %0 : vector<1x16x256xf32> to vector<16x256xf32>
    %c0_2 = arith.constant 0 : index
    %c0_3 = arith.constant 0 : index
    %c0_4 = arith.constant 0 : index
    %2 = vector.load %arg5[%c0_2, %c0_3, %c0_4] : memref<1x16x1xf32, #tpu.memory_space<vmem>>, vector<1x16x1xf32>
    %3 = vector.shape_cast %2 : vector<1x16x1xf32> to vector<16x1xf32>
    %4 = vector.broadcast %3 : vector<16x1xf32> to vector<16x256xf32>
    %5 = arith.mulf %1, %4 : vector<16x256xf32>
    %c0_5 = arith.constant 0 : index
    %c0_6 = arith.constant 0 : index
    %6 = vector.load %arg6[%c0_5, %c0_6] : memref<2x16xf32, #tpu.memory_space<vmem>>, vector<2x16xf32>
    %cst = arith.constant dense<0.000000e+00> : vector<2x256xf32>
    %7 = tpu.matmul %6, %5, %cst {dimension_numbers = #tpu.dot_dimension_numbers<[1], [0], [0], [1], [0, 0, 1, 1], [], []>, precision = #tpu.contract_precision<fp32>} : vector<2x16xf32>, vector<16x256xf32>, vector<2x256xf32> -> vector<2x256xf32>
    %c0_7 = arith.constant 0 : index
    %c0_8 = arith.constant 0 : index
    %8 = vector.load %arg7[%c0_7, %c0_8] : memref<2x1xf32, #tpu.memory_space<vmem>>, vector<2x1xf32>
    %9 = vector.broadcast %8 : vector<2x1xf32> to vector<2x256xf32>
    %10 = arith.addf %7, %9 : vector<2x256xf32>
    %cst_9 = arith.constant 0.000000e+00 : f32
    %11 = vector.broadcast %cst_9 : f32 to vector<2x256xf32>
    %12 = arith.maximumf %10, %11 : vector<2x256xf32>
    %c0_10 = arith.constant 0 : index
    %c0_11 = arith.constant 0 : index
    %13 = vector.load %arg8[%c0_10, %c0_11] : memref<2x1xf32, #tpu.memory_space<vmem>>, vector<2x1xf32>
    %14 = vector.broadcast %13 : vector<2x1xf32> to vector<2x256xf32>
    %15 = arith.mulf %12, %14 : vector<2x256xf32>
    %cst_12 = arith.constant dense<0.000000e+00> : vector<256xf32>
    %16 = vector.multi_reduction <add>, %15, %cst_12 [0] : vector<2x256xf32> to vector<256xf32>
    %17 = vector.shape_cast %16 : vector<256xf32> to vector<1x256xf32>
    %c0_13 = arith.constant 0 : index
    %c0_14 = arith.constant 0 : index
    %18 = vector.load %arg9[%c0_13, %c0_14] : memref<1x1xf32, #tpu.memory_space<vmem>>, vector<1x1xf32>
    %19 = vector.broadcast %18 : vector<1x1xf32> to vector<1x256xf32>
    %20 = arith.addf %17, %19 : vector<1x256xf32>
    %21 = arith.negf %20 : vector<1x256xf32>
    %22 = math.exp %21 : vector<1x256xf32>
    %cst_15 = arith.constant 1.000000e+00 : f32
    %23 = vector.broadcast %cst_15 : f32 to vector<1x256xf32>
    %24 = arith.addf %23, %22 : vector<1x256xf32>
    %25 = arith.divf %23, %24 : vector<1x256xf32>
    %c0_16 = arith.constant 0 : index
    %c0_17 = arith.constant 0 : index
    %c0_18 = arith.constant 0 : index
    %26 = vector.load %arg4[%c0_16, %c0_17, %c0_18] : memref<1x16x256xf32, #tpu.memory_space<vmem>>, vector<1x16x256xf32>
    %27 = vector.shape_cast %26 : vector<1x16x256xf32> to vector<16x256xf32>
    %28 = vector.broadcast %25 : vector<1x256xf32> to vector<16x256xf32>
    %29 = arith.mulf %5, %28 : vector<16x256xf32>
    %30 = arith.addf %27, %29 : vector<16x256xf32>
    %c0_19 = arith.constant 0 : index
    %c0_20 = arith.constant 0 : index
    %c0_21 = arith.constant 0 : index
    %31 = vector.load %arg3[%c0_19, %c0_20, %c0_21] : memref<1x16x256xf32, #tpu.memory_space<vmem>>, vector<1x16x256xf32>
    %32 = vector.shape_cast %31 : vector<1x16x256xf32> to vector<16x256xf32>
    %33 = arith.addf %30, %32 : vector<16x256xf32>
    %c0_22 = arith.constant 0 : index
    %c0_23 = arith.constant 0 : index
    %c0_24 = arith.constant 0 : index
    %34 = vector.load %arg10[%c0_22, %c0_23, %c0_24] : memref<1x16x256xf32, #tpu.memory_space<vmem>>, vector<1x16x256xf32>
    %35 = vector.shape_cast %34 : vector<1x16x256xf32> to vector<16x256xf32>
    %36 = vector.shape_cast %33 : vector<16x256xf32> to vector<1x16x256xf32>
    tpu.vector_store %arg10[%c0_22, %c0_23, %c0_24], %36 {strides = array<i32>} : memref<1x16x256xf32, #tpu.memory_space<vmem>>, vector<1x16x256xf32>,
    return
  }
  func.func @transform_0(%arg0: i32, %arg1: i32) -> (i32, i32, i32) {
    %c0_i32 = arith.constant 0 : i32
    %c0_i32_0 = arith.constant 0 : i32
    return %arg0, %c0_i32, %arg1 : i32, i32, i32
  }
  func.func @transform_1(%arg0: i32, %arg1: i32) -> (i32, i32, i32) {
    %c0_i32 = arith.constant 0 : i32
    %c0_i32_0 = arith.constant 0 : i32
    return %arg0, %c0_i32, %arg1 : i32, i32, i32
  }
  func.func @transform_2(%arg0: i32, %arg1: i32) -> (i32, i32, i32) {
    %c0_i32 = arith.constant 0 : i32
    %c0_i32_0 = arith.constant 0 : i32
    return %arg0, %c0_i32, %arg1 : i32, i32, i32
  }
  func.func @transform_3(%arg0: i32, %arg1: i32) -> (i32, i32, i32) {
    %c0_i32 = arith.constant 0 : i32
    %c0_i32_0 = arith.constant 0 : i32
    %c0_i32_1 = arith.constant 0 : i32
    return %arg0, %c0_i32, %c0_i32_0 : i32, i32, i32
  }
  func.func @transform_4(%arg0: i32, %arg1: i32) -> (i32, i32) {
    %c0_i32 = arith.constant 0 : i32
    %c0_i32_0 = arith.constant 0 : i32
    %c0_i32_1 = arith.constant 0 : i32
    return %c0_i32, %c0_i32_0 : i32, i32
  }
  func.func @transform_5(%arg0: i32, %arg1: i32) -> (i32, i32) {
    %c0_i32 = arith.constant 0 : i32
    %c0_i32_0 = arith.constant 0 : i32
    %c0_i32_1 = arith.constant 0 : i32
    return %c0_i32, %c0_i32_0 : i32, i32
  }
  func.func @transform_6(%arg0: i32, %arg1: i32) -> (i32, i32) {
    %c0_i32 = arith.constant 0 : i32
    %c0_i32_0 = arith.constant 0 : i32
    %c0_i32_1 = arith.constant 0 : i32
    return %c0_i32, %c0_i32_0 : i32, i32
  }
  func.func @transform_7(%arg0: i32, %arg1: i32) -> (i32, i32) {
    %c0_i32 = arith.constant 0 : i32
    %c0_i32_0 = arith.constant 0 : i32
    %c0_i32_1 = arith.constant 0 : i32
    return %c0_i32, %c0_i32_0 : i32, i32
  }
  func.func @transform_8(%arg0: i32, %arg1: i32) -> (i32, i32, i32) {
    %c0_i32 = arith.constant 0 : i32
    %c0_i32_0 = arith.constant 0 : i32
    return %arg0, %c0_i32, %arg1 : i32, i32, i32
  }
}

</mosaic_0001>

<bundles_post_ra>
// kernel: basic_layer_pallas.2
= control target key start
LH: loop header
LB: loop body
LE: loop exit
PB: predicated region body
PF: predicated region fallthrough
CT: control target
= control target key end

     0   :  { %s3716_s23 = smov 0   ;;  %s3718_s24 = smov 0   ;;  %s4383_s0 = inlined_call_operand.vmem [shape: f32[2,32,144], index: 0, kind: input, shape index: {}]   ;;  %s4384_s1 = inlined_call_operand.vmem [shape: f32[32,32], index: 1, kind: input, shape index: {}]   ;;  %s4385_s2 = inlined_call_operand.vmem [shape: f32[32,1], index: 2, kind: input, shape index: {}]   ;;  %s4386_s3 = inlined_call_operand.vmem [shape: f32[32,32], index: 3, kind: input, shape index: {}]   ;;  %s4387_s4 = inlined_call_operand.vmem [shape: f32[32,1], index: 4, kind: input, shape index: {}]   ;;  %s4388_s5 = inlined_call_operand.vmem [shape: f32[12,32], index: 5, kind: input, shape index: {}]   ;;  %s4389_s6 = inlined_call_operand.vmem [shape: f32[12,1], index: 6, kind: input, shape index: {}]   ;;  %s4390_s7 = inlined_call_operand.vmem [shape: f32[12,1], index: 7, kind: input, shape index: {}]   ;;  %s4391_s8 = inlined_call_operand.vmem [shape: f32[3,1], index: 8, kind: input, shape index: {}]   ;;  %s4392_s9 = inlined_call_operand.vmem [shape: f32[3,12], index: 9, kind: input, shape index: {}]   ;;  %s4393_s10 = inlined_call_operand.vmem [shape: f32[3,1], index: 10, kind: input, shape index: {}]   ;;  %s4394_s11 = inlined_call_operand.<no memory space> [shape: f32[1,1], index: 11, kind: input, shape index: {}]   ;;  %s4395_s12 = inlined_call_operand.vmem [shape: f32[2,32,144], index: 12, kind: output, shape index: {}]  }
   0x1   :  { %v17_v0 = vstv %s4394_s11  ;;  %s3720_s25 = smov 0  }
   0x2   :  { %18 = vst [vmem:[#allocation2] sm:$0x1] %v17_v0 }
   0x3 LB: > { %s36_s11 = sadd.s32 1, %s3640_s24  ;;  %p3265_p0 = scmp.ge.s32.totalorder %s3644_s25, 1  ;;  %s3644_s25 = sphi %s3720_s25, %s24_s25   ;;  %s3640_s24 = sphi %s3718_s24, %s4397_s24   ;;  %s3636_s23 = sphi %s3716_s23, %s4396_s23  }
   0x4   : > { %p38_p1 = scmp.ge.s32.totalorder %s36_s11, 2  ;;  %p385_p2 = scmp.lt.s32.totalorder %s3644_s25, 3 }
   0x6   : > { %s4399_s11 = smov (%p38_p1, %s36_s11), 0  ;;  %p386_p3 = pnand %p3265_p0, %p385_p2 }
   0x7   : > { %p436_p4 = scmp.lt.s32.totalorder (!%p386_p3), %s3636_s23, 1  ;;  %v463_v1 = vld [vmem:[%s4384_s1] sm:$0xff] (!%p386_p3)  ;;  %vm491_vm0 = vcmask (!%p386_p3), 261120   ;;  %v3646_v2 = vmov (!%p386_p3), 0.0   ;;  %v3647_v4 = vmov (!%p386_p3), 0   ;;  %v464_v6 = vld [vmem:[%s4384_s1 + $0x8] sm:$0xff] (!%p386_p3) }
   0x8   : > { %389 = sbr.rel (%p386_p3) target bundleno = 1258 (0x4ea), region = 68  ;;  %725 = vmatprep.mubr.f32.mxu0 (!%p386_p3), %v3646_v2  ;;  %576 = vmatprep.mubr.f32.mxu1 (!%p386_p3), %v3646_v2  ;;  %v467_v3 = vld [vmem:[%s4385_s2] sm:$0xff] (!%p386_p3)  ;;  %v3745_v5 = vsel (!%p386_p3), %vm491_vm0, %v463_v1, 0  ;;  %v469_v7 = vld [vmem:[%s4385_s2 + $0x10] sm:$0xff] (!%p386_p3)  ;;  %v468_v8 = vld [vmem:[%s4385_s2 + $0x8] sm:$0xff] (!%p386_p3)  ;;  %v3775_v14 = vsel (!%p386_p3), %vm491_vm0, %v464_v6, 0 }
   0x9   : > { %3604 = vset.pattern.permute.xlu0 (!%p386_p3), %v3647_v4  ;;  %3605 = vset.pattern.permute.xlu1 (!%p386_p3), %v3647_v4  ;;  %v470_v9 = vld [vmem:[%s4385_s2 + $0x18] sm:$0xff] (!%p386_p3)  ;;  %v3772_v13 = vand.u32 (!%p386_p3), 4294901760, %v3745_v5  ;;  %v1222_v26 = vld [vmem:[%s4387_s4] sm:$0xff] (!%p386_p3)  ;;  %v1223_v31 = vld [vmem:[%s4387_s4 + $0x8] sm:$0xff] (!%p386_p3)  ;;  %vm2595_vm9 = vcmask (!%p386_p3), 97280   ;;  %vm2599_vm14 = vcmask (!%p386_p3), 1043456  }
   0xa   : > { %473 = vperm.xlu0 (!%p386_p3), %3604, %v467_v3   ;;  %483 = vperm.xlu1 (!%p386_p3), %3605, %v469_v7   ;;  %v1224_v44 = vld [vmem:[%s4387_s4 + $0x10] sm:$0xff] (!%p386_p3)  ;;  %v1225_v49 = vld [vmem:[%s4387_s4 + $0x18] sm:$0xff] (!%p386_p3)  ;;  %v3881_v7 = vand.u32 (!%p386_p3), 4294901760, %v3775_v14  ;;  %vm3117_vm15 = vcmask (!%p386_p3), 1042432  }
   0xb   : > { %v3875_v0 = vsub.f32 (!%p386_p3), %v3745_v5, %v3772_v13  ;;  %v465_v1 = vld [vmem:[%s4384_s1 + $0x10] sm:$0xff] (!%p386_p3)  ;;  %v1951_v5 = vld [vmem:[%s4389_s6 + $0x8] sm:$0xf] (!%p386_p3) }
   0xe   : > { %478 = vperm.xlu0 (!%p386_p3), %3604, %v468_v8   ;;  %488 = vperm.xlu1 (!%p386_p3), %3605, %v470_v9   ;;  %v579_v9 = vand.u32 (!%p386_p3), 4294901760, %v3875_v0 }
   0xf   : > { %s4401_s23 = smov (!%p436_p4, %s3636_s23), 1 }
  0x10   : > { %s3276_s16 = sshll.u32 %s4401_s23, 6 }
  0x11   : > { %s443_s21 = scalar_lea.vmem %s4383_s0, %s3276_s16  ;;  %s453_s22 = scalar_lea.vmem %s4395_s12, %s3276_s16 }
  0x12   : > { %v3765_v10 = vld [vmem:[%s443_s21 + $0x8] sm:$0xff]  ;;  %v3767_v11 = vld [vmem:[%s443_s21 + $0x18] sm:$0xff]  ;;  %v3769_v12 = vld [vmem:[%s443_s21] sm:$0xff]  ;;  %1228 = vperm.xlu0 %3604, %v1222_v26   ;;  %1233 = vperm.xlu1 %3605, %v1223_v31  }
  0x13   : > { %v504_v15 = vand.u32 4294901760, %v3765_v10  ;;  %v508_v16 = vand.u32 4294901760, %v3767_v11  ;;  %v3779_v17 = vld [vmem:[%s443_s21 + $0x10] sm:$0xff]  ;;  %v506_v18 = vand.u32 4294901760, %v3769_v12  ;;  %v3782_v19 = vld [vmem:[%s443_s21 + $0x28] sm:$0xff]  ;;  %v3784_v20 = vld [vmem:[%s443_s21 + $0x38] sm:$0xff] }
  0x14   : > { %v510_v21 = vand.u32 4294901760, %v3779_v17  ;;  %v512_v22 = vand.u32 4294901760, %v3782_v19  ;;  %v516_v23 = vand.u32 4294901760, %v3784_v20  ;;  %v3789_v24 = vld [vmem:[%s443_s21 + $0x20] sm:$0xff]  ;;  %v3791_v25 = vld [vmem:[%s443_s21 + $0x30] sm:$0xff]  ;;  %v466_v31 = vld [vmem:[%s4384_s1 + $0x18] sm:$0xff] }
  0x15   : > { %v3797_v27 = vsub.f32 %v3765_v10, %v504_v15  ;;  %v3800_v28 = vsub.f32 %v3767_v11, %v508_v16  ;;  %v3805_v29 = vsub.f32 %v3769_v12, %v506_v18  ;;  %v514_v30 = vand.u32 4294901760, %v3789_v24 }
  0x16   : > { %v3812_v32 = vsub.f32 %v3779_v17, %v510_v21  ;;  %v3817_v33 = vsub.f32 %v3782_v19, %v512_v22  ;;  %v3822_v34 = vsub.f32 %v3784_v20, %v516_v23  ;;  %v518_v35 = vand.u32 4294901760, %v3791_v25  ;;  %1238 = vperm.xlu0 %3604, %v1224_v44   ;;  %1243 = vperm.xlu1 %3605, %v1225_v49   ;;  %v2573_v19 = vld [vmem:[%s4390_s7 + $0x8] sm:$0xf]  ;;  %v2572_v44 = vld [vmem:[%s4390_s7] sm:$0xff] }
  0x17   : > { %v623_v36 = vand.u32 4294901760, %v3797_v27  ;;  %v635_v37 = vand.u32 4294901760, %v3800_v28  ;;  %v629_v38 = vand.u32 4294901760, %v3805_v29  ;;  %v3831_v39 = vsub.f32 %v3789_v24, %v514_v30 }
  0x18   : > { %v641_v40 = vand.u32 4294901760, %v3812_v32  ;;  %v647_v41 = vand.u32 4294901760, %v3817_v33  ;;  %v659_v42 = vand.u32 4294901760, %v3822_v34  ;;  %v3839_v43 = vsub.f32 %v3791_v25, %v518_v35 }
  0x19   : > { %v624_v45 = vsub.f32 %v3797_v27, %v623_v36  ;;  %v636_v46 = vsub.f32 %v3800_v28, %v635_v37  ;;  %v630_v47 = vsub.f32 %v3805_v29, %v629_v38  ;;  %v653_v48 = vand.u32 4294901760, %v3831_v39 }
  0x1a   : > { %v642_v50 = vsub.f32 %v3812_v32, %v641_v40  ;;  %v648_v51 = vsub.f32 %v3817_v33, %v647_v41  ;;  %v660_v52 = vsub.f32 %v3822_v34, %v659_v42  ;;  %v665_v53 = vand.u32 4294901760, %v3839_v43  ;;  %1959 = vperm.xlu0 %3604, %v1951_v5  }
  0x1b   : > { %v625_v54 = vand.u32 4294901760, %v624_v45  ;;  %v637_v55 = vand.u32 4294901760, %v636_v46  ;;  %v631_v56 = vand.u32 4294901760, %v630_v47  ;;  %v654_v57 = vsub.f32 %v3831_v39, %v653_v48 }
  0x1c   : > { %v643_v58 = vand.u32 4294901760, %v642_v50  ;;  %v649_v59 = vand.u32 4294901760, %v648_v51  ;;  %v661_v60 = vand.u32 4294901760, %v660_v52  ;;  %v666_v61 = vsub.f32 %v3839_v43, %v665_v53  ;;  %v3109_v50 = vld [vmem:[%s4393_s10] sm:$0x7] }
  0x1d   : > { %v3286_v62 = vpack.c.bf16 %v637_v55, %v625_v54  ;;  %v655_v63 = vand.u32 4294901760, %v654_v57  ;;  %v3883_v8 = vpack.c.bf16 %v508_v16, %v504_v15  ;;  %v499_v11 = vsel %vm491_vm0, %v465_v1, 0  ;;  %v1950_v15 = vld [vmem:[%s4389_s6] sm:$0xff] }
  0x1e   : > { %v3288_v3 = vpack.c.bf16 %v643_v58, %v631_v56  ;;  %v3290_v4 = vpack.c.bf16 %v661_v60, %v649_v59  ;;  %v667_v6 = vand.u32 4294901760, %v666_v61  ;;  %v3892_v17 = vsub.f32 %v3775_v14, %v3881_v7  ;;  %1954 = vperm.xlu1 %3605, %v1950_v15   ;;  %2581 = vperm.xlu0 %3604, %v2573_v19   ;;  %v3133_v56 = vld [vmem:[#allocation2] sm:$0x1] }
  0x1f   : > { %3287 = vmatprep.subr.bf16.mxu0 %v3286_v62  ;;  %v3896_v26 = vpack.c.bf16 %v510_v21, %v506_v18  ;;  %v3294_v16 = vpack.c.bf16 %v3800_v28, %v3797_v27  ;;  %v3910_v14 = vpack.c.bf16 %v516_v23, %v512_v22  ;;  %3279 = vmatprep.subr.bf16.mxu1 %v3883_v8  ;;  %v3917_v18 = vand.u32 4294901760, %v499_v11 }
  0x20   : > { %3289 = vmatpush1.bf16.msra.mxu0 %v3288_v3  ;;  %v3292_v10 = vpack.c.bf16 %v667_v6, %v655_v63  ;;  %v580_v12 = vsub.f32 %v3875_v0, %v579_v9  ;;  %v590_v21 = vand.u32 4294901760, %v3892_v17  ;;  %v3296_v20 = vpack.c.bf16 %v3812_v32, %v3805_v29 }
  0x21   : > { %3291 = vmatprep.subr.bf16.mxu0 %v3290_v4  ;;  %3281 = vmatpush1.bf16.msra.mxu1 %v3896_v26  ;;  %v502_v22 = vsel %vm491_vm0, %v466_v31, 0  ;;  %v3931_v23 = vpack.c.bf16 %v518_v35, %v514_v30  ;;  %v3298_v45 = vpack.c.bf16 %v3822_v34, %v3817_v33  ;;  %v3939_v46 = vsub.f32 %v499_v11, %v3917_v18  ;;  %v2589_v35 = vld [vmem:[%s4391_s8] sm:$0x7] }
  0x22   : > { %3283 = vmatprep.subr.bf16.mxu1 %v3910_v14  ;;  %v581_v47 = vand.u32 4294901760, %v580_v12  ;;  %v591_v24 = vsub.f32 %v3892_v17, %v590_v21  ;;  %v3946_v25 = vand.u32 4294901760, %v502_v22  ;;  %2576 = vperm.xlu1 %3605, %v2572_v44   ;;  %v3300_v49 = vpack.c.bf16 %v3839_v43, %v3831_v39 }
  0x23   : > { %v601_v30 = vand.u32 4294901760, %v3939_v46  ;;  %2592 = vperm.xlu0 %3604, %v2589_v35   ;;  %v3310_v60 = vpack.c.bf16 %v635_v37, %v623_v36  ;;  %v3312_v27 = vpack.c.bf16 %v641_v40, %v629_v38  ;;  %v3314_v28 = vpack.c.bf16 %v659_v42, %v647_v41  ;;  %v1218_v40 = vld [vmem:[%s4386_s3] sm:$0xff]  ;;  %v1219_v42 = vld [vmem:[%s4386_s3 + $0x8] sm:$0xff] }
  0x24   : > { %3293 = vmatpush1.bf16.msra.mxu0 %v3292_v10  ;;  %v611_v51 = vsub.f32 %v502_v22, %v3946_v25  ;;  %v592_v52 = vand.u32 4294901760, %v591_v24  ;;  %v3316_v36 = vpack.c.bf16 %v665_v53, %v653_v48  ;;  %v1247_v41 = vsel %vm491_vm0, %v1218_v40, 0 }
  0x25   : > { %3295 = vmatprep.subr.bf16.mxu0 %v3294_v16  ;;  %3285 = vmatpush1.bf16.msra.mxu1 %v3931_v23  ;;  %v602_v54 = vsub.f32 %v3939_v46, %v601_v30  ;;  %v4032_v43 = vand.u32 4294901760, %v1247_v41  ;;  %v1250_v48 = vsel %vm491_vm0, %v1219_v42, 0  ;;  %v1221_v16 = vld [vmem:[%s4386_s3 + $0x18] sm:$0xff] }
  0x26   : > { %v612_v55 = vand.u32 4294901760, %v611_v51  ;;  %3112 = vperm.xlu1 %3605, %v3109_v50   ;;  %v4038_v61 = vand.u32 4294901760, %v1250_v48  ;;  %v4066_v22 = vsel %vm491_vm0, %v1221_v16, 0 }
  0x27   : > { %727 = vmatmul.mubr.f32.vlgmr.msra.gmra.mrb[0].mxu0 %v3772_v13  ;;  %v603_v57 = vand.u32 4294901760, %v602_v54  ;;  %3136 = vperm.xlu0 %3604, %v3133_v56   ;;  %v4036_v53 = vsub.f32 %v1247_v41, %v4032_v43 }
  0x28   : > { %732 = vmatprep.mubr.f32.mxu0 %v3646_v2  ;;  %3297 = vmatpush1.bf16.msra.mxu0 %v3296_v20  ;;  %v613_v58 = vsub.f32 %v611_v51, %v612_v55  ;;  %v4045_v1 = vsub.f32 %v1250_v48, %v4038_v61 }
  0x29   : > { %3299 = vmatprep.subr.bf16.mxu0 %v3298_v45  ;;  %582 = vmatmul.mubr.f32.vlgmr.msra.gmra.mrb[0].mxu1 %v581_v47  ;;  %v1333_v63 = vand.u32 4294901760, %v4036_v53 }
  0x2a   : > { %587 = vmatprep.mubr.f32.mxu1 %v3646_v2  ;;  %v614_v59 = vand.u32 4294901760, %v613_v58  ;;  %v1344_v5 = vand.u32 4294901760, %v4045_v1 }
  0x2b   : > { %734 = vmatmul.mubr.f32.gmra.mrb[2].mxu0 %v3881_v7 }
  0x2c   : > { %739 = vmatprep.mubr.f32.mxu0 %v3646_v2  ;;  %3301 = vmatpush1.bf16.msra.mxu0 %v3300_v49  ;;  %v4063_v20 = vsub.f32 %v4045_v1, %v1344_v5 }
  0x2d   : > { %3303 = vmatprep.subr.bf16.mxu0 %v3883_v8  ;;  %593 = vmatmul.mubr.f32.gmra.mrb[2].mxu1 %v592_v52  ;;  %v4072_v52 = vand.u32 4294901760, %v4066_v22 }
  0x2e   : > { %598 = vmatprep.mubr.f32.mxu1 %v3646_v2 }
  0x2f   : > { %741 = vmatmul.mubr.f32.gmra.mrb[4].mxu0 %v3917_v18 }
  0x30   : > { %746 = vmatprep.mubr.f32.mxu0 %v3646_v2 }
  0x31   : > { %604 = vmatmul.mubr.f32.gmra.mrb[4].mxu1 %v603_v57 }
  0x32   : > { %609 = vmatprep.mubr.f32.mxu1 %v3646_v2 }
  0x33   : > { %748 = vmatmul.mubr.f32.gmra.mrb[6].mxu0 %v3946_v25 }
  0x34   : > { %834 = vmatprep.mubr.f32.mxu0 %v3646_v2 }
  0x35   : > { %615 = vmatmul.mubr.f32.gmra.mrb[6].mxu1 %v614_v59 }
  0x36   : > { %1330 = vmatprep.mubr.f32.mxu1 %v3646_v2 }
  0x37   : > { %837 = vmatmul.mubr.f32.vlgmr.msra.gmra.mrb[0].mxu0 %v3875_v0  ;;  %v1220_v0 = vld [vmem:[%s4386_s3 + $0x10] sm:$0xff] }
  0x38   : > { %842 = vmatprep.mubr.f32.mxu0 %v3646_v2  ;;  %3305 = vmatpush1.bf16.msra.mxu0 %v3896_v26  ;;  %v1253_v6 = vsel %vm491_vm0, %v1220_v0, 0 }
  0x39   : > { %3307 = vmatprep.subr.bf16.mxu0 %v3910_v14  ;;  %v4054_v15 = vand.u32 4294901760, %v1253_v6 }
  0x3b   : > { %845 = vmatmul.mubr.f32.gmra.mrb[2].mxu0 %v3892_v17  ;;  %v4069_v47 = vsub.f32 %v1253_v6, %v4054_v15 }
  0x3c   : > { %850 = vmatprep.mubr.f32.mxu0 %v3646_v2  ;;  %3309 = vmatpush1.bf16.msra.mxu0 %v3931_v23 }
  0x3d   : > { %3311 = vmatprep.subr.bf16.mxu0 %v3310_v60 }
  0x3f   : > { %853 = vmatmul.mubr.f32.gmra.mrb[4].mxu0 %v3939_v46 }
  0x40   : > { %858 = vmatprep.mubr.f32.mxu0 %v3646_v2 }
  0x43   : > { %861 = vmatmul.mubr.f32.gmra.mrb[6].mxu0 %v611_v51 }
  0x44   : > { %939 = vmatprep.mubr.f32.mxu0 %v3646_v2 }
  0x47   : > { %943 = vmatmul.mubr.f32.vlgmr.msra.gmra.mrb[0].mxu0 %v579_v9 }
  0x48   : > { %948 = vmatprep.mubr.f32.mxu0 %v3646_v2  ;;  %3313 = vmatpush1.bf16.msra.mxu0 %v3312_v27 }
  0x49   : > { %3315 = vmatprep.subr.bf16.mxu0 %v3314_v28 }
  0x4b   : > { %952 = vmatmul.mubr.f32.gmra.mrb[2].mxu0 %v590_v21 }
  0x4c   : > { %957 = vmatprep.mubr.f32.mxu0 %v3646_v2  ;;  %3317 = vmatpush1.bf16.msra.mxu0 %v3316_v36 }
  0x4d   : > { %3319 = vmatprep.subr.bf16.mxu0 %v3883_v8 }
  0x4f   : > { %961 = vmatmul.mubr.f32.gmra.mrb[4].mxu0 %v601_v30 }
  0x50   : > { %966 = vmatprep.mubr.f32.mxu0 %v3646_v2 }
  0x53   : > { %970 = vmatmul.mubr.f32.gmra.mrb[6].mxu0 %v612_v55 }
  0x54   : > { %1064 = vmatprep.mubr.f32.mxu0 %v3646_v2 }
  0x57   : > { %1066 = vmatmul.mubr.f32.vlgmr.msra.gmra.mrb[0].mxu0 %v3772_v13 }
  0x58   : > { %1071 = vmatprep.mubr.f32.mxu0 %v3646_v2  ;;  %3321 = vmatpush1.bf16.msra.mxu0 %v3896_v26 }
  0x59   : > { %3323 = vmatprep.subr.bf16.mxu0 %v3910_v14 }
  0x5b   : > { %1073 = vmatmul.mubr.f32.gmra.mrb[2].mxu0 %v3881_v7 }
  0x5c   : > { %1078 = vmatprep.mubr.f32.mxu0 %v3646_v2  ;;  %3325 = vmatpush1.bf16.msra.mxu0 %v3931_v23 }
  0x5f   : > { %1080 = vmatmul.mubr.f32.gmra.mrb[4].mxu0 %v3917_v18 }
  0x60   : > { %1085 = vmatprep.mubr.f32.mxu0 %v3646_v2 }
  0x63   : > { %1087 = vmatmul.mubr.f32.gmra.mrb[6].mxu0 %v3946_v25 }
  0x64   : > { %1165 = vmatprep.mubr.f32.mxu0 %v3646_v2 }
  0x67   : > { %1167 = vmatmul.mubr.f32.vlgmr.msra.gmra.mrb[0].mxu0 %v3772_v13 }
  0x68   : > { %1172 = vmatprep.mubr.f32.mxu0 %v3646_v2 }
  0x6b   : > { %1174 = vmatmul.mubr.f32.gmra.mrb[2].mxu0 %v3881_v7  ;;  %v4051_v7 = vsub.f32 %v4036_v53, %v1333_v63 }
  0x6c   : > { %1179 = vmatprep.mubr.f32.mxu0 %v3646_v2 }
  0x6f   : > { %1181 = vmatmul.mubr.f32.gmra.mrb[4].mxu0 %v3917_v18  ;;  %v1335_v18 = vand.u32 4294901760, %v4051_v7 }
  0x70   : > { %1186 = vmatprep.mubr.f32.mxu0 %v3646_v2 }
  0x73   : > { %1188 = vmatmul.mubr.f32.gmra.mrb[6].mxu0 %v3946_v25 }
  0x74   : > { %2040 = vmatprep.mubr.f32.mxu0 %v3646_v2 }
  0x89   : > { %v474_v62 = vpop.permute.xlu0 %473  ;;  %v484_v10 = vpop.permute.xlu1 %483 }
  0x8d   : > { %v479_v8 = vpop.permute.xlu0 %478  ;;  %v489_v49 = vpop.permute.xlu1 %488 }
  0xfc   : > { %v583_v29 = vpop.f32.mrb[0].mxu1 }
  0xfd   : > { %v585_v32 = vpop.f32.mrb[1].mxu1  ;;  %v584_v3 = vadd.f32 %v583_v29, %v474_v62 }
  0xfe   : > { %v586_v4 = vadd.f32 %v585_v32, %v474_v62 }
 0x100   : > { %v594_v33 = vpop.f32.mrb[2].mxu1 }
 0x101   : > { %v596_v34 = vpop.f32.mrb[3].mxu1  ;;  %v595_v17 = vadd.f32 %v594_v33, %v479_v8 }
 0x102   : > { %v597_v14 = vadd.f32 %v596_v34, %v479_v8 }
 0x104   : > { %v605_v37 = vpop.f32.mrb[4].mxu1 }
 0x105   : > { %v607_v13 = vpop.f32.mrb[5].mxu1  ;;  %v606_v44 = vadd.f32 %v605_v37, %v484_v10 }
 0x106   : > { %v608_v30 = vadd.f32 %v607_v13, %v484_v10 }
 0x108   : > { %v616_v38 = vpop.f32.mrb[6].mxu1 }
 0x109   : > { %v618_v39 = vpop.f32.mrb[7].mxu1  ;;  %v617_v56 = vadd.f32 %v616_v38, %v489_v49 }
 0x10a   : > { %v619_v60 = vadd.f32 %v618_v39, %v489_v49 }
 0x13a   : > { %v1168_v9 = vpop.f32.mrb[0].mxu0 }
 0x13b   : > { %v3447_v11 = vadd.f32 %v1168_v9, %v584_v3  ;;  %v1170_v26 = vpop.f32.mrb[1].mxu0 }
 0x13c   : > { %v3449_v31 = vadd.f32 %v1170_v26, %v586_v4 }
 0x13d   : > { %vm1194_vm1 = vcmp.ge.f32.partialorder %v3447_v11, 0.0  ;;  %v1202_v12 = vmul.f32 0.01, %v3447_v11 }
 0x13e   : > { %vm1195_vm2 = vcmp.ge.f32.partialorder %v3449_v31, 0.0  ;;  %v1203_v21 = vmul.f32 0.01, %v3449_v31  ;;  %v1175_v19 = vpop.f32.mrb[2].mxu0 }
 0x13f   : > { %v1210_v23 = vsel %vm1194_vm1, %v3447_v11, %v1202_v12  ;;  %v3451_v45 = vadd.f32 %v1175_v19, %v595_v17  ;;  %v1177_v46 = vpop.f32.mrb[3].mxu0  ;;  %v1355_v19 = vand.u32 4294901760, %v4069_v47  ;;  %vm3166_vm1 = vcmask 130048  }
 0x140   : > { %v1260_v24 = vand.u32 4294901760, %v1210_v23  ;;  %v1211_v25 = vsel %vm1195_vm2, %v3449_v31, %v1203_v21  ;;  %v3453_v35 = vadd.f32 %v1177_v46, %v597_v14 }
 0x141   : > { %v1258_v50 = vand.u32 4294901760, %v1211_v25  ;;  %vm1196_vm3 = vcmp.ge.f32.partialorder %v3451_v45, 0.0  ;;  %v1204_v51 = vmul.f32 0.01, %v3451_v45 }
 0x142   : > { %v4074_v54 = vsub.f32 %v1210_v23, %v1260_v24  ;;  %vm1197_vm4 = vcmp.ge.f32.partialorder %v3453_v35, 0.0  ;;  %v1205_v55 = vmul.f32 0.01, %v3453_v35  ;;  %v1182_v57 = vpop.f32.mrb[4].mxu0 }
 0x143   : > { %v4076_v58 = vsub.f32 %v1211_v25, %v1258_v50  ;;  %v1212_v59 = vsel %vm1196_vm3, %v3451_v45, %v1204_v51  ;;  %v3455_v27 = vadd.f32 %v1182_v57, %v606_v44  ;;  %v1184_v28 = vpop.f32.mrb[5].mxu0 }
 0x144   : > { %v1383_v36 = vand.u32 4294901760, %v4074_v54  ;;  %v1264_v29 = vand.u32 4294901760, %v1212_v59  ;;  %v1213_v32 = vsel %vm1197_vm4, %v3453_v35, %v1205_v55  ;;  %v3457_v33 = vadd.f32 %v1184_v28, %v608_v30 }
 0x145   : > { %v1262_v34 = vand.u32 4294901760, %v1213_v32  ;;  %vm1198_vm5 = vcmp.ge.f32.partialorder %v3455_v27, 0.0  ;;  %v1206_v37 = vmul.f32 0.01, %v3455_v27  ;;  %v1377_v13 = vand.u32 4294901760, %v4076_v58 }
 0x146   : > { %v4080_v40 = vsub.f32 %v1212_v59, %v1264_v29  ;;  %vm1199_vm6 = vcmp.ge.f32.partialorder %v3457_v33, 0.0  ;;  %v1207_v38 = vmul.f32 0.01, %v3457_v33  ;;  %v1189_v41 = vpop.f32.mrb[6].mxu0  ;;  %v4082_v42 = vpack.c.bf16 %v1264_v29, %v1260_v24 }
 0x147   : > { %v4084_v39 = vsub.f32 %v1213_v32, %v1262_v34  ;;  %v1214_v48 = vsel %vm1198_vm5, %v3455_v27, %v1206_v37  ;;  %v3459_v62 = vadd.f32 %v1189_v41, %v617_v56  ;;  %v1191_v0 = vpop.f32.mrb[7].mxu0  ;;  %v4086_v3 = vpack.c.bf16 %v1262_v34, %v1258_v50 }
 0x148   : > { %v1395_v4 = vand.u32 4294901760, %v4080_v40  ;;  %v1268_v6 = vand.u32 4294901760, %v1214_v48  ;;  %v1215_v8 = vsel %vm1199_vm6, %v3457_v33, %v1207_v38  ;;  %v3461_v9 = vadd.f32 %v1191_v0, %v619_v60 }
 0x149   : > { %v1266_v10 = vand.u32 4294901760, %v1215_v8  ;;  %vm1200_vm7 = vcmp.ge.f32.partialorder %v3459_v62, 0.0  ;;  %v1208_v11 = vmul.f32 0.01, %v3459_v62  ;;  %3327 = vmatprep.subr.bf16.mxu1 %v4086_v3  ;;  %v1378_v17 = vsub.f32 %v4076_v58, %v1377_v13 }
 0x14a   : > { %v4091_v26 = vsub.f32 %v1214_v48, %v1268_v6  ;;  %vm1201_vm8 = vcmp.ge.f32.partialorder %v3461_v9, 0.0  ;;  %v1209_v16 = vmul.f32 0.01, %v3461_v9  ;;  %3329 = vmatpush1.bf16.msra.mxu1 %v4082_v42  ;;  %v1389_v31 = vand.u32 4294901760, %v4084_v39 }
 0x14b   : > { %v4095_v14 = vsub.f32 %v1215_v8, %v1266_v10  ;;  %v1216_v12 = vsel %vm1200_vm7, %v3459_v62, %v1208_v11  ;;  %v1384_v21 = vsub.f32 %v4074_v54, %v1383_v36  ;;  %v1396_v25 = vsub.f32 %v4080_v40, %v1395_v4 }
 0x14c   : > { %v1407_v23 = vand.u32 4294901760, %v4091_v26  ;;  %v1272_v44 = vand.u32 4294901760, %v1216_v12  ;;  %v1217_v45 = vsel %vm1201_vm8, %v3461_v9, %v1209_v16  ;;  %v1390_v46 = vsub.f32 %v4084_v39, %v1389_v31 }
 0x14d   : > { %v1270_v24 = vand.u32 4294901760, %v1217_v45  ;;  %v1401_v30 = vand.u32 4294901760, %v4095_v14  ;;  %v4107_v35 = vsub.f32 %v4066_v22, %v4072_v52  ;;  %v1379_v51 = vand.u32 4294901760, %v1378_v17 }
 0x14e   : > { %v1418_v49 = vsub.f32 %v1216_v12, %v1272_v44  ;;  %v4109_v50 = vpack.c.bf16 %v1272_v44, %v1268_v6  ;;  %v1391_v55 = vand.u32 4294901760, %v1390_v46  ;;  %v1385_v59 = vand.u32 4294901760, %v1384_v21 }
 0x14f   : > { %v1412_v56 = vsub.f32 %v1217_v45, %v1270_v24  ;;  %v4111_v57 = vpack.c.bf16 %v1270_v24, %v1266_v10  ;;  %v1397_v60 = vand.u32 4294901760, %v1396_v25  ;;  %v1408_v29 = vsub.f32 %v4091_v26, %v1407_v23 }
 0x150   : > { %v1419_v27 = vand.u32 4294901760, %v1418_v49  ;;  %v3334_v28 = vpack.c.bf16 %v1391_v55, %v1379_v51  ;;  %v3342_v32 = vpack.c.bf16 %v4084_v39, %v4076_v58  ;;  %v1402_v33 = vsub.f32 %v4095_v14, %v1401_v30 }
 0x151   : > { %3331 = vmatprep.subr.bf16.mxu1 %v4111_v57  ;;  %v3336_v22 = vpack.c.bf16 %v1397_v60, %v1385_v59  ;;  %v1413_v34 = vand.u32 4294901760, %v1412_v56  ;;  %v3344_v37 = vpack.c.bf16 %v4080_v40, %v4074_v54  ;;  %v3346_v41 = vpack.c.bf16 %v1412_v56, %v4095_v14 }
 0x152   : > { %3333 = vmatpush1.bf16.msra.mxu1 %v4109_v50  ;;  %v1420_v38 = vsub.f32 %v1418_v49, %v1419_v27  ;;  %v3348_v48 = vpack.c.bf16 %v1418_v49, %v4091_v26  ;;  %v3358_v62 = vpack.c.bf16 %v1389_v31, %v1377_v13  ;;  %v3360_v58 = vpack.c.bf16 %v1395_v4, %v1383_v36 }
 0x153   : > { %3335 = vmatprep.subr.bf16.mxu1 %v3334_v28  ;;  %v1414_v0 = vsub.f32 %v1412_v56, %v1413_v34  ;;  %v3362_v39 = vpack.c.bf16 %v1413_v34, %v1401_v30  ;;  %v3364_v6 = vpack.c.bf16 %v1419_v27, %v1407_v23  ;;  %v1346_v8 = vand.u32 4294901760, %v4063_v20 }
 0x154   : > { %v1409_v9 = vand.u32 4294901760, %v1408_v29  ;;  %v1421_v10 = vand.u32 4294901760, %v1420_v38  ;;  %v1403_v40 = vand.u32 4294901760, %v1402_v33  ;;  %v1356_v13 = vsub.f32 %v4069_v47, %v1355_v19 }
 0x155   : > { %1336 = vmatmul.mubr.f32.vlgmr.msra.gmra.mrb[8].mxu1 %v1335_v18  ;;  %v1415_v11 = vand.u32 4294901760, %v1414_v0  ;;  %v1366_v17 = vand.u32 4294901760, %v4107_v35 }
 0x156   : > { %3337 = vmatpush1.bf16.msra.mxu1 %v3336_v22  ;;  %1341 = vmatprep.mubr.f32.mxu1 %v3646_v2  ;;  %v3340_v54 = vpack.c.bf16 %v1421_v10, %v1409_v9  ;;  %v1357_v20 = vand.u32 4294901760, %v1356_v13 }
 0x157   : > { %v3338_v36 = vpack.c.bf16 %v1415_v11, %v1403_v40  ;;  %v1367_v4 = vsub.f32 %v4107_v35, %v1366_v17 }
 0x159   : > { %1347 = vmatmul.mubr.f32.gmra.mrb[10].mxu1 %v1346_v8  ;;  %3339 = vmatprep.subr.bf16.mxu1 %v3338_v36  ;;  %v1368_v7 = vand.u32 4294901760, %v1367_v4 }
 0x15a   : > { %3341 = vmatpush1.bf16.msra.mxu1 %v3340_v54  ;;  %1352 = vmatprep.mubr.f32.mxu1 %v3646_v2 }
 0x15b   : > { %3343 = vmatprep.subr.bf16.mxu1 %v3342_v32 }
 0x15d   : > { %1358 = vmatmul.mubr.f32.gmra.mrb[12].mxu1 %v1357_v20 }
 0x15e   : > { %1363 = vmatprep.mubr.f32.mxu1 %v3646_v2 }
 0x161   : > { %1369 = vmatmul.mubr.f32.gmra.mrb[14].mxu1 %v1368_v7 }
 0x162   : > { %1479 = vmatprep.mubr.f32.mxu1 %v3646_v2 }
 0x165   : > { %1481 = vmatmul.mubr.f32.vlgmr.msra.gmra.mrb[8].mxu1 %v4032_v43 }
 0x166   : > { %3345 = vmatpush1.bf16.msra.mxu1 %v3344_v37  ;;  %1486 = vmatprep.mubr.f32.mxu1 %v3646_v2 }
 0x167   : > { %3347 = vmatprep.subr.bf16.mxu1 %v3346_v41 }
 0x169   : > { %1488 = vmatmul.mubr.f32.gmra.mrb[10].mxu1 %v4038_v61 }
 0x16a   : > { %3349 = vmatpush1.bf16.msra.mxu1 %v3348_v48  ;;  %1493 = vmatprep.mubr.f32.mxu1 %v3646_v2 }
 0x16b   : > { %3351 = vmatprep.subr.bf16.mxu1 %v4086_v3 }
 0x16d   : > { %1495 = vmatmul.mubr.f32.gmra.mrb[12].mxu1 %v4054_v15 }
 0x16e   : > { %1500 = vmatprep.mubr.f32.mxu1 %v3646_v2 }
 0x171   : > { %1502 = vmatmul.mubr.f32.gmra.mrb[14].mxu1 %v4072_v52 }
 0x172   : > { %1588 = vmatprep.mubr.f32.mxu1 %v3646_v2 }
 0x175   : > { %1591 = vmatmul.mubr.f32.vlgmr.msra.gmra.mrb[8].mxu1 %v4036_v53  ;;  %v1948_v53 = vld [vmem:[%s4388_s5] sm:$0xff] }
 0x176   : > { %3353 = vmatpush1.bf16.msra.mxu1 %v4082_v42  ;;  %1596 = vmatprep.mubr.f32.mxu1 %v3646_v2 }
 0x177   : > { %3355 = vmatprep.subr.bf16.mxu1 %v4111_v57 }
 0x179   : > { %1599 = vmatmul.mubr.f32.gmra.mrb[10].mxu1 %v4045_v1  ;;  %v1963_v1 = vsel %vm491_vm0, %v1948_v53, 0 }
 0x17a   : > { %3357 = vmatpush1.bf16.msra.mxu1 %v4109_v50  ;;  %1604 = vmatprep.mubr.f32.mxu1 %v3646_v2 }
 0x17b   : > { %3359 = vmatprep.subr.bf16.mxu1 %v3358_v62 }
 0x17d   : > { %1607 = vmatmul.mubr.f32.gmra.mrb[12].mxu1 %v4069_v47  ;;  %v4198_v47 = vand.u32 4294901760, %v1963_v1 }
 0x17e   : > { %1612 = vmatprep.mubr.f32.mxu1 %v3646_v2 }
 0x17f   : > { %v4212_v23 = vsub.f32 %v1963_v1, %v4198_v47 }
 0x181   : > { %1615 = vmatmul.mubr.f32.gmra.mrb[14].mxu1 %v4107_v35  ;;  %v2043_v27 = vand.u32 4294901760, %v4212_v23 }
 0x182   : > { %1693 = vmatprep.mubr.f32.mxu1 %v3646_v2 }
 0x183   : > { %v2044_v8 = vsub.f32 %v4212_v23, %v2043_v27 }
 0x185   : > { %1697 = vmatmul.mubr.f32.vlgmr.msra.gmra.mrb[8].mxu1 %v1333_v63  ;;  %v1229_v63 = vpop.permute.xlu0 %1228 }
 0x186   : > { %3361 = vmatpush1.bf16.msra.mxu1 %v3360_v58  ;;  %1702 = vmatprep.mubr.f32.mxu1 %v3646_v2 }
 0x187   : > { %3363 = vmatprep.subr.bf16.mxu1 %v3362_v39 }
 0x189   : > { %1706 = vmatmul.mubr.f32.gmra.mrb[10].mxu1 %v1344_v5  ;;  %v1239_v44 = vpop.permute.xlu0 %1238 }
 0x18a   : > { %3365 = vmatpush1.bf16.msra.mxu1 %v3364_v6  ;;  %1711 = vmatprep.mubr.f32.mxu1 %v3646_v2 }
 0x18b   : > { %3367 = vmatprep.subr.bf16.mxu1 %v4086_v3 }
 0x18d   : > { %1715 = vmatmul.mubr.f32.gmra.mrb[12].mxu1 %v1355_v19 }
 0x18e   : > { %1720 = vmatprep.mubr.f32.mxu1 %v3646_v2 }
 0x191   : > { %1724 = vmatmul.mubr.f32.gmra.mrb[14].mxu1 %v1366_v17 }
 0x192   : > { %1818 = vmatprep.mubr.f32.mxu1 %v3646_v2 }
 0x195   : > { %1820 = vmatmul.mubr.f32.vlgmr.msra.gmra.mrb[8].mxu1 %v4032_v43 }
 0x196   : > { %3369 = vmatpush1.bf16.msra.mxu1 %v4082_v42  ;;  %1825 = vmatprep.mubr.f32.mxu1 %v3646_v2 }
 0x197   : > { %3371 = vmatprep.subr.bf16.mxu1 %v4111_v57 }
 0x199   : > { %1827 = vmatmul.mubr.f32.gmra.mrb[10].mxu1 %v4038_v61 }
 0x19a   : > { %3373 = vmatpush1.bf16.msra.mxu1 %v4109_v50  ;;  %1832 = vmatprep.mubr.f32.mxu1 %v3646_v2 }
 0x19d   : > { %1834 = vmatmul.mubr.f32.gmra.mrb[12].mxu1 %v4054_v15 }
 0x19e   : > { %1839 = vmatprep.mubr.f32.mxu1 %v3646_v2 }
 0x1a1   : > { %1841 = vmatmul.mubr.f32.gmra.mrb[14].mxu1 %v4072_v52 }
 0x1a2   : > { %1919 = vmatprep.mubr.f32.mxu1 %v3646_v2 }
 0x1a5   : > { %1921 = vmatmul.mubr.f32.vlgmr.msra.gmra.mrb[8].mxu1 %v4032_v43 }
 0x1a6   : > { %1926 = vmatprep.mubr.f32.mxu1 %v3646_v2 }
 0x1a9   : > { %1928 = vmatmul.mubr.f32.gmra.mrb[10].mxu1 %v4038_v61 }
 0x1aa   : > { %1933 = vmatprep.mubr.f32.mxu1 %v3646_v2 }
 0x1ad   : > { %1935 = vmatmul.mubr.f32.gmra.mrb[12].mxu1 %v4054_v15  ;;  %v1949_v15 = vld [vmem:[%s4388_s5 + $0x8] sm:$0xf] }
 0x1ae   : > { %1940 = vmatprep.mubr.f32.mxu1 %v3646_v2  ;;  %v1966_v14 = vsel %vm491_vm0, %v1949_v15, 0  ;;  %vm3125_vm0 = vcmask 124928  }
 0x1af   : > { %v4215_v24 = vand.u32 4294901760, %v1966_v14 }
 0x1b1   : > { %1942 = vmatmul.mubr.f32.gmra.mrb[14].mxu1 %v4072_v52  ;;  %v1234_v52 = vpop.permute.xlu1 %1233  ;;  %v4242_v33 = vsub.f32 %v1966_v14, %v4215_v24 }
 0x1b2   : > { %2770 = vmatprep.mubr.f32.mxu1 %v3646_v2 }
 0x1b3   : > { %v2054_v40 = vand.u32 4294901760, %v4242_v33 }
 0x1b5   : > { %v1244_v28 = vpop.permute.xlu1 %1243 }
 0x278   : > { %v1922_v43 = vpop.f32.mrb[8].mxu1 }
 0x279   : > { %v4191_v5 = vadd.f32 %v1922_v43, %v1229_v63  ;;  %v1924_v61 = vpop.f32.mrb[9].mxu1 }
 0x27a   : > { %v4193_v18 = vadd.f32 %v1924_v61, %v1229_v63  ;;  %v2045_v63 = vand.u32 4294901760, %v2044_v8  ;;  %v2055_v61 = vsub.f32 %v4242_v33, %v2054_v40 }
 0x27b   : > { %v1970_v26 = vand.u32 4294901760, %v4191_v5 }
 0x27c   : > { %v1968_v42 = vand.u32 4294901760, %v4193_v18  ;;  %v1929_v3 = vpop.f32.mrb[10].mxu1 }
 0x27d   : > { %v4202_v16 = vadd.f32 %v1929_v3, %v1234_v52  ;;  %v1931_v31 = vpop.f32.mrb[11].mxu1  ;;  %v4218_v25 = vsub.f32 %v4191_v5, %v1970_v26 }
 0x27e   : > { %v4206_v12 = vsub.f32 %v4193_v18, %v1968_v42  ;;  %v4208_v21 = vadd.f32 %v1931_v31, %v1234_v52 }
 0x27f   : > { %v1974_v19 = vand.u32 4294901760, %v4202_v16  ;;  %v2071_v34 = vand.u32 4294901760, %v4218_v25 }
 0x280   : > { %v1972_v45 = vand.u32 4294901760, %v4208_v21  ;;  %v1936_v46 = vpop.f32.mrb[12].mxu1  ;;  %v2065_v56 = vand.u32 4294901760, %v4206_v12 }
 0x281   : > { %v4221_v30 = vsub.f32 %v4202_v16, %v1974_v19  ;;  %v4223_v35 = vadd.f32 %v1936_v46, %v1239_v44  ;;  %v1938_v49 = vpop.f32.mrb[13].mxu1  ;;  %v4233_v57 = vpack.c.bf16 %v1974_v19, %v1970_v26  ;;  %v2072_v13 = vsub.f32 %v4218_v25, %v2071_v34 }
 0x282   : > { %v4226_v50 = vsub.f32 %v4208_v21, %v1972_v45  ;;  %v4228_v51 = vadd.f32 %v1938_v49, %v1239_v44  ;;  %v4230_v55 = vpack.c.bf16 %v1972_v45, %v1968_v42  ;;  %v2066_v0 = vsub.f32 %v4206_v12, %v2065_v56 }
 0x283   : > { %v2083_v59 = vand.u32 4294901760, %v4221_v30  ;;  %v1978_v60 = vand.u32 4294901760, %v4223_v35  ;;  %v2073_v26 = vand.u32 4294901760, %v2072_v13  ;;  %v2056_v44 = vand.u32 4294901760, %v2055_v61 }
 0x284   : > { %v1976_v29 = vand.u32 4294901760, %v4228_v51  ;;  %v1943_v32 = vpop.f32.mrb[14].mxu1  ;;  %3375 = vmatprep.subr.bf16.mxu0 %v4230_v55  ;;  %v2077_v22 = vand.u32 4294901760, %v4226_v50  ;;  %v2067_v4 = vand.u32 4294901760, %v2066_v0 }
 0x285   : > { %v4246_v37 = vsub.f32 %v4223_v35, %v1978_v60  ;;  %v4248_v38 = vadd.f32 %v1943_v32, %v1244_v28  ;;  %v1945_v41 = vpop.f32.mrb[15].mxu1  ;;  %3377 = vmatpush1.bf16.msra.mxu0 %v4233_v57  ;;  %v2084_v39 = vsub.f32 %v4221_v30, %v2083_v59  ;;  %v3392_v32 = vpack.c.bf16 %v4221_v30, %v4218_v25  ;;  %v1955_v25 = vpop.permute.xlu1 %1954 }
 0x286   : > { %v4252_v48 = vsub.f32 %v4228_v51, %v1976_v29  ;;  %v4254_v62 = vadd.f32 %v1945_v41, %v1244_v28  ;;  %v2078_v58 = vsub.f32 %v4226_v50, %v2077_v22 }
 0x287   : > { %v1982_v6 = vand.u32 4294901760, %v4248_v38  ;;  %v2095_v17 = vand.u32 4294901760, %v4246_v37  ;;  %v2085_v43 = vand.u32 4294901760, %v2084_v39 }
 0x288   : > { %v1980_v9 = vand.u32 4294901760, %v4254_v62  ;;  %v2079_v10 = vand.u32 4294901760, %v2078_v58  ;;  %v2089_v11 = vand.u32 4294901760, %v4252_v48  ;;  %v3408_v58 = vpack.c.bf16 %v2083_v59, %v2071_v34 }
 0x289   : > { %v4277_v54 = vsub.f32 %v4248_v38, %v1982_v6  ;;  %v4282_v7 = vpack.c.bf16 %v1982_v6, %v1978_v60  ;;  %v2096_v42 = vsub.f32 %v4246_v37, %v2095_v17  ;;  %v3384_v14 = vpack.c.bf16 %v2085_v43, %v2073_v26 }
 0x28a   : > { %v2100_v36 = vsub.f32 %v4254_v62, %v1980_v9  ;;  %v4280_v20 = vpack.c.bf16 %v1980_v9, %v1976_v29  ;;  %v3382_v1 = vpack.c.bf16 %v2079_v10, %v2067_v4  ;;  %v2090_v15 = vsub.f32 %v4252_v48, %v2089_v11 }
 0x28b   : > { %v2107_v53 = vand.u32 4294901760, %v4277_v54  ;;  %v2097_v49 = vand.u32 4294901760, %v2096_v42  ;;  %v3390_v29 = vpack.c.bf16 %v4226_v50, %v4206_v12  ;;  %v3396_v0 = vpack.c.bf16 %v4277_v54, %v4246_v37 }
 0x28c   : > { %3379 = vmatprep.subr.bf16.mxu0 %v4280_v20  ;;  %v2101_v52 = vand.u32 4294901760, %v2100_v36  ;;  %v2091_v45 = vand.u32 4294901760, %v2090_v15  ;;  %v3394_v41 = vpack.c.bf16 %v2100_v36, %v4252_v48  ;;  %v3406_v48 = vpack.c.bf16 %v2077_v22, %v2065_v56 }
 0x28d   : > { %v2108_v3 = vsub.f32 %v4277_v54, %v2107_v53  ;;  %3381 = vmatpush1.bf16.msra.mxu0 %v4282_v7  ;;  %v3412_v12 = vpack.c.bf16 %v2107_v53, %v2095_v17 }
 0x28e   : > { %3383 = vmatprep.subr.bf16.mxu0 %v3382_v1  ;;  %v2102_v31 = vsub.f32 %v2100_v36, %v2101_v52  ;;  %v3410_v39 = vpack.c.bf16 %v2101_v52, %v2089_v11 }
 0x28f   : > { %v2109_v19 = vand.u32 4294901760, %v2108_v3 }
 0x290   : > { %2046 = vmatmul.mubr.f32.vlgmr.msra.gmra.mrb[8].mxu0 %v2045_v63  ;;  %v2103_v46 = vand.u32 4294901760, %v2102_v31 }
 0x291   : > { %3385 = vmatpush1.bf16.msra.mxu0 %v3384_v14  ;;  %2051 = vmatprep.mubr.f32.mxu0 %v3646_v2  ;;  %v3388_v28 = vpack.c.bf16 %v2109_v19, %v2097_v49 }
 0x292   : > { %v3386_v60 = vpack.c.bf16 %v2103_v46, %v2091_v45 }
 0x294   : > { %2057 = vmatmul.mubr.f32.gmra.mrb[10].mxu0 %v2056_v44  ;;  %3387 = vmatprep.subr.bf16.mxu0 %v3386_v60 }
 0x295   : > { %3389 = vmatpush1.bf16.msra.mxu0 %v3388_v28  ;;  %2167 = vmatprep.mubr.f32.mxu0 %v3646_v2 }
 0x296   : > { %3391 = vmatprep.subr.bf16.mxu0 %v3390_v29 }
 0x298   : > { %2169 = vmatmul.mubr.f32.vlgmr.msra.gmra.mrb[8].mxu0 %v4198_v47 }
 0x299   : > { %3393 = vmatpush1.bf16.msra.mxu0 %v3392_v32  ;;  %2174 = vmatprep.mubr.f32.mxu0 %v3646_v2 }
 0x29a   : > { %3395 = vmatprep.subr.bf16.mxu0 %v3394_v41 }
 0x29c   : > { %2176 = vmatmul.mubr.f32.gmra.mrb[10].mxu0 %v4215_v24 }
 0x29d   : > { %3397 = vmatpush1.bf16.msra.mxu0 %v3396_v0  ;;  %2262 = vmatprep.mubr.f32.mxu0 %v3646_v2 }
 0x29e   : > { %3399 = vmatprep.subr.bf16.mxu0 %v4230_v55 }
 0x2a0   : > { %2265 = vmatmul.mubr.f32.vlgmr.msra.gmra.mrb[8].mxu0 %v4212_v23  ;;  %v2588_v23 = vld [vmem:[%s4392_s9] sm:$0x7] }
 0x2a1   : > { %3401 = vmatpush1.bf16.msra.mxu0 %v4233_v57  ;;  %2270 = vmatprep.mubr.f32.mxu0 %v3646_v2  ;;  %v2597_v30 = vsel %vm2595_vm9, %v2588_v23, 0 }
 0x2a2   : > { %3403 = vmatprep.subr.bf16.mxu0 %v4280_v20  ;;  %v4347_v59 = vand.u32 4294901760, %v2597_v30 }
 0x2a4   : > { %2273 = vmatmul.mubr.f32.gmra.mrb[10].mxu0 %v4242_v33  ;;  %v2577_v33 = vpop.permute.xlu1 %2576 }
 0x2a5   : > { %3405 = vmatpush1.bf16.msra.mxu0 %v4282_v7  ;;  %2351 = vmatprep.mubr.f32.mxu0 %v3646_v2 }
 0x2a6   : > { %3407 = vmatprep.subr.bf16.mxu0 %v3406_v48 }
 0x2a8   : > { %2355 = vmatmul.mubr.f32.vlgmr.msra.gmra.mrb[8].mxu0 %v2043_v27 }
 0x2a9   : > { %3409 = vmatpush1.bf16.msra.mxu0 %v3408_v58  ;;  %2360 = vmatprep.mubr.f32.mxu0 %v3646_v2 }
 0x2aa   : > { %3411 = vmatprep.subr.bf16.mxu0 %v3410_v39 }
 0x2ac   : > { %2364 = vmatmul.mubr.f32.gmra.mrb[10].mxu0 %v2054_v40  ;;  %v2676_v40 = vsub.f32 %v2597_v30, %v4347_v59 }
 0x2ad   : > { %3413 = vmatpush1.bf16.msra.mxu0 %v3412_v12  ;;  %2458 = vmatprep.mubr.f32.mxu0 %v3646_v2 }
 0x2ae   : > { %3415 = vmatprep.subr.bf16.mxu0 %v4230_v55  ;;  %v2677_v43 = vand.u32 4294901760, %v2676_v40 }
 0x2b0   : > { %2460 = vmatmul.mubr.f32.vlgmr.msra.gmra.mrb[8].mxu0 %v4198_v47  ;;  %v2678_v31 = vsub.f32 %v2676_v40, %v2677_v43 }
 0x2b1   : > { %3417 = vmatpush1.bf16.msra.mxu0 %v4233_v57  ;;  %2465 = vmatprep.mubr.f32.mxu0 %v3646_v2 }
 0x2b2   : > { %3419 = vmatprep.subr.bf16.mxu0 %v4280_v20  ;;  %v2679_v29 = vand.u32 4294901760, %v2678_v31 }
 0x2b4   : > { %2467 = vmatmul.mubr.f32.gmra.mrb[10].mxu0 %v4215_v24 }
 0x2b5   : > { %3421 = vmatpush1.bf16.msra.mxu0 %v4282_v7  ;;  %2545 = vmatprep.mubr.f32.mxu0 %v3646_v2 }
 0x2b8   : > { %2547 = vmatmul.mubr.f32.vlgmr.msra.gmra.mrb[8].mxu0 %v4198_v47  ;;  %v1960_v47 = vpop.permute.xlu0 %1959 }
 0x2b9   : > { %2552 = vmatprep.mubr.f32.mxu0 %v3646_v2 }
 0x2bc   : > { %2554 = vmatmul.mubr.f32.gmra.mrb[10].mxu0 %v4215_v24  ;;  %v2582_v36 = vpop.permute.xlu0 %2581 }
 0x2bd   : > { %2674 = vmatprep.mubr.f32.mxu0 %v3646_v2 }
 0x38b   : > { %v2548_v50 = vpop.f32.mrb[8].mxu0 }
 0x38c   : > { %v3470_v55 = vadd.f32 %v2548_v50, %v1955_v25  ;;  %v2550_v56 = vpop.f32.mrb[9].mxu0 }
 0x38d   : > { %v3471_v57 = vadd.f32 %v2550_v56, %v1955_v25 }
 0x38e   : > { %vm2560_vm10 = vcmp.ge.f32.partialorder %v3470_v55, 0.0  ;;  %v2564_v27 = vmul.f32 0.01, %v3470_v55 }
 0x38f   : > { %vm2561_vm11 = vcmp.ge.f32.partialorder %v3471_v57, 0.0  ;;  %v2565_v24 = vmul.f32 0.01, %v3471_v57  ;;  %v2555_v22 = vpop.f32.mrb[10].mxu0 }
 0x390   : > { %v2568_v34 = vsel %vm2560_vm10, %v3470_v55, %v2564_v27  ;;  %v3472_v37 = vadd.f32 %v2555_v22, %v1960_v47  ;;  %v2557_v6 = vpop.f32.mrb[11].mxu0  ;;  %v2593_v27 = vpop.permute.xlu0 %2592 }
 0x391   : > { %v2584_v8 = vmul.f32 %v2577_v33, %v2568_v34  ;;  %v2569_v9 = vsel %vm2561_vm11, %v3471_v57, %v2565_v24  ;;  %v3473_v10 = vadd.f32 %v2557_v6, %v1960_v47 }
 0x392   : > { %v2585_v11 = vmul.f32 %v2577_v33, %v2569_v9  ;;  %vm2562_vm12 = vcmp.ge.f32.partialorder %v3472_v37, 0.0  ;;  %v2566_v13 = vmul.f32 0.01, %v3472_v37 }
 0x393   : > { %v2608_v17 = vand.u32 4294901760, %v2584_v8  ;;  %vm2563_vm13 = vcmp.ge.f32.partialorder %v3473_v10, 0.0  ;;  %v2567_v54 = vmul.f32 0.01, %v3473_v10 }
 0x394   : > { %v2570_v20 = vsel %vm2562_vm12, %v3472_v37, %v2566_v13  ;;  %v2606_v4 = vand.u32 4294901760, %v2585_v11 }
 0x395   : > { %v2693_v7 = vsub.f32 %v2584_v8, %v2608_v17  ;;  %v2586_v53 = vmul.f32 %v2582_v36, %v2570_v20  ;;  %v2571_v63 = vsel %vm2563_vm13, %v3473_v10, %v2567_v54 }
 0x396   : > { %v2587_v1 = vmul.f32 %v2582_v36, %v2571_v63  ;;  %v2687_v61 = vsub.f32 %v2585_v11, %v2606_v4  ;;  %v3139_v36 = vlaneseq }
 0x397   : > { %v2601_v15 = vsel %vm2599_vm14, %v2586_v53, 0  ;;  %v2694_v3 = vand.u32 4294901760, %v2693_v7 }
 0x398   : > { %v2612_v52 = vand.u32 4294901760, %v2601_v15  ;;  %v2604_v42 = vsel %vm2599_vm14, %v2587_v1, 0  ;;  %v2688_v14 = vand.u32 4294901760, %v2687_v61 }
 0x399   : > { %v2610_v26 = vand.u32 4294901760, %v2604_v42  ;;  %v2695_v49 = vsub.f32 %v2693_v7, %v2694_v3 }
 0x39a   : > { %v2705_v19 = vsub.f32 %v2601_v15, %v2612_v52  ;;  %v3424_v44 = vpack.c.bf16 %v2612_v52, %v2608_v17  ;;  %v2689_v32 = vsub.f32 %v2687_v61, %v2688_v14 }
 0x39b   : > { %v3422_v45 = vpack.c.bf16 %v2610_v26, %v2606_v4  ;;  %v2699_v46 = vsub.f32 %v2604_v42, %v2610_v26  ;;  %v2696_v23 = vand.u32 4294901760, %v2695_v49  ;;  %v3137_v26 = vpop.permute.xlu0 %3136 }
 0x39c   : > { %v2706_v60 = vand.u32 4294901760, %v2705_v19  ;;  %v3432_v28 = vpack.c.bf16 %v2705_v19, %v2693_v7  ;;  %v2690_v30 = vand.u32 4294901760, %v2689_v32 }
 0x39d   : > { %3423 = vmatprep.subr.bf16.mxu0 %v3422_v45  ;;  %v2700_v41 = vand.u32 4294901760, %v2699_v46  ;;  %v3430_v0 = vpack.c.bf16 %v2699_v46, %v2687_v61 }
 0x39e   : > { %3425 = vmatpush1.bf16.msra.mxu0 %v3424_v44  ;;  %v2707_v48 = vsub.f32 %v2705_v19, %v2706_v60  ;;  %v3440_v58 = vpack.c.bf16 %v2706_v60, %v2694_v3 }
 0x39f   : > { %v2701_v39 = vsub.f32 %v2699_v46, %v2700_v41  ;;  %v3438_v12 = vpack.c.bf16 %v2700_v41, %v2688_v14 }
 0x3a0   : > { %v2708_v25 = vand.u32 4294901760, %v2707_v48 }
 0x3a1   : > { %2680 = vmatmul.mubr.f32.vlgmr.msra.gmra.mrb[12].mxu0 %v2679_v29  ;;  %v2702_v50 = vand.u32 4294901760, %v2701_v39 }
 0x3a2   : > { %v3428_v55 = vpack.c.bf16 %v2708_v25, %v2696_v23 }
 0x3a3   : > { %v3426_v56 = vpack.c.bf16 %v2702_v50, %v2690_v30 }
 0x3a5   : > { %3427 = vmatprep.subr.bf16.mxu1 %v3426_v56 }
 0x3a6   : > { %3429 = vmatpush1.bf16.msra.mxu1 %v3428_v55 }
 0x3a7   : > { %3431 = vmatprep.subr.bf16.mxu1 %v3430_v0 }
 0x3a9   : > { %2772 = vmatmul.mubr.f32.vlgmr.msra.gmra.mrb[16].mxu1 %v4347_v59 }
 0x3aa   : > { %3433 = vmatpush1.bf16.msra.mxu1 %v3432_v28  ;;  %2850 = vmatprep.mubr.f32.mxu1 %v3646_v2 }
 0x3ab   : > { %3435 = vmatprep.subr.bf16.mxu1 %v3422_v45 }
 0x3b1   : > { %2853 = vmatmul.mubr.f32.vlgmr.msra.gmra.mrb[16].mxu1 %v2676_v40 }
 0x3b2   : > { %3437 = vmatpush1.bf16.msra.mxu1 %v3424_v44  ;;  %2927 = vmatprep.mubr.f32.mxu1 %v3646_v2 }
 0x3b3   : > { %3439 = vmatprep.subr.bf16.mxu1 %v3438_v12 }
 0x3b9   : > { %2931 = vmatmul.mubr.f32.vlgmr.msra.gmra.mrb[16].mxu1 %v2677_v43  ;;  %v3140_v43 = vshrl.u32 %v3139_v36, 7 }
 0x3ba   : > { %3441 = vmatpush1.bf16.msra.mxu1 %v3440_v58  ;;  %3013 = vmatprep.mubr.f32.mxu1 %v3646_v2 }
 0x3bb   : > { %3443 = vmatprep.subr.bf16.mxu1 %v3422_v45  ;;  %v3141_v42 = vsub.s32 0, %v3140_v43 }
 0x3c1   : > { %3015 = vmatmul.mubr.f32.vlgmr.msra.gmra.mrb[16].mxu1 %v4347_v59 }
 0x3c2   : > { %3445 = vmatpush1.bf16.msra.mxu1 %v3424_v44  ;;  %3089 = vmatprep.mubr.f32.mxu1 %v3646_v2  ;;  %v3142_v44 = vrot.slane %v3137_v26, %v3141_v42 }
 0x3c9   : > { %3091 = vmatmul.mubr.f32.vlgmr.msra.gmra.mrb[16].mxu1 %v4347_v59  ;;  %v3113_v59 = vpop.permute.xlu1 %3112 }
 0x474   : > { %v2681_v57 = vpop.f32.mrb[12].mxu0 }
 0x475   : > { %v2683_v47 = vpop.f32.mrb[13].mxu0  ;;  %v2682_v24 = vadd.f32 %v2681_v57, %v2593_v27 }
 0x476   : > { %v2684_v22 = vadd.f32 %v2683_v47, %v2593_v27 }
 0x49c   : > { %v3092_v33 = vpop.f32.mrb[16].mxu1 }
 0x49d   : > { %v3475_v34 = vadd.f32 %v3092_v33, %v2682_v24  ;;  %v3094_v37 = vpop.f32.mrb[17].mxu1 }
 0x49e   : > { %v3477_v6 = vadd.f32 %v3094_v37, %v2684_v22 }
 0x49f   : > { %v3270_v8 = vmul.f32 -1.442695, %v3475_v34 }
 0x4a0   : > { %v3271_v9 = vmul.f32 -1.442695, %v3477_v6 }
 0x4a1   : > { %3606 = vpow2.f32 %v3270_v8 }
 0x4a2   : > { %3608 = vpow2.f32 %v3271_v9 }
 0x4ab   : > { %v3607_v10 = vpop.eup %3606 }
 0x4ac   : > { %v3609_v40 = vpop.eup %3608  ;;  %v3103_v11 = vadd.f32 1.0, %v3607_v10 }
 0x4ad   : > { %v3104_v13 = vadd.f32 1.0, %v3609_v40 }
 0x4ae   : > { %3610 = vrcp.f32 %v3103_v11 }
 0x4af   : > { %3612 = vrcp.f32 %v3104_v13 }
 0x4b8   : > { %v3611_v2 = vpop.eup %3610 }
 0x4b9   : > { %v3613_v17 = vpop.eup %3612  ;;  %v3115_v54 = vmul.f32 %v3611_v2, %v3113_v59 }
 0x4ba   : > { %v3116_v20 = vmul.f32 %v3613_v17, %v3113_v59 }
 0x4bb   : > { %v3118_v4 = vsel %vm3117_vm15, %v3115_v54, 0.0 }
 0x4bc   : > { %v3119_v7 = vrot.slane %v3118_v4, 4  ;;  %v3126_v53 = vsel %vm3125_vm0, %v3116_v20, 0.0 }
 0x4bd   : > { %v3127_v63 = vrot.slane %v3126_v53, 4 }
 0x4be   : > { %v3120_v1 = vadd.f32 %v3119_v7, %v3118_v4 }
 0x4bf   : > { %v3128_v61 = vadd.f32 %v3127_v63, %v3126_v53 }
 0x4c0   : > { %v3121_v15 = vrot.slane %v3120_v1, 2 }
 0x4c1   : > { %v3129_v52 = vrot.slane %v3128_v61, 2 }
 0x4c2   : > { %v3122_v3 = vadd.f32 %v3121_v15, %v3120_v1 }
 0x4c3   : > { %v3130_v31 = vadd.f32 %v3129_v52, %v3128_v61 }
 0x4c4   : > { %v3123_v14 = vrot.slane %v3122_v3, 1 }
 0x4c5   : > { %v3131_v19 = vrot.slane %v3130_v31, 1 }
 0x4c6   : > { %v3124_v45 = vadd.f32 %v3123_v14, %v3122_v3 }
 0x4c7   : > { %v3132_v46 = vadd.f32 %v3131_v19, %v3130_v31 }
 0x4c8   : > { %v3143_v49 = vadd.f32 %v3142_v44, %v3124_v45 }
 0x4c9   : > { %v3144_v60 = vadd.f32 %v3142_v44, %v3132_v46 }
 0x4ca   : > { %v3272_v28 = vmul.f32 -1.442695, %v3143_v49 }
 0x4cb   : > { %v3273_v29 = vmul.f32 -1.442695, %v3144_v60 }
 0x4cc   : > { %3614 = vpow2.f32 %v3272_v28 }
 0x4cd   : > { %3616 = vpow2.f32 %v3273_v29 }
 0x4d6   : > { %v3615_v32 = vpop.eup %3614 }
 0x4d7   : > { %v3617_v41 = vpop.eup %3616  ;;  %v3151_v0 = vadd.f32 1.0, %v3615_v32 }
 0x4d8   : > { %v3152_v48 = vadd.f32 1.0, %v3617_v41 }
 0x4d9   : > { %3618 = vrcp.f32 %v3151_v0 }
 0x4da   : > { %3620 = vrcp.f32 %v3152_v48 }
 0x4e3   : > { %v3619_v58 = vpop.eup %3618 }
 0x4e4   : > { %v3621_v39 = vpop.eup %3620  ;;  %v3157_v12 = vmul.f32 %v3619_v58, %v4191_v5  ;;  %v3159_v23 = vmul.f32 %v3619_v58, %v4202_v16  ;;  %v3161_v25 = vmul.f32 %v3619_v58, %v4223_v35  ;;  %v3163_v30 = vmul.f32 %v3619_v58, %v4248_v38 }
 0x4e5   : > { %v3158_v50 = vmul.f32 %v3621_v39, %v4193_v18  ;;  %v3160_v55 = vmul.f32 %v3621_v39, %v4208_v21  ;;  %v3162_v56 = vmul.f32 %v3621_v39, %v4228_v51  ;;  %v3164_v57 = vmul.f32 %v3621_v39, %v4254_v62 }
 0x4e6   : > { %3165 = vst [vmem:[%s453_s22] sm:$0xff] %v3157_v12  ;;  %3168 = vst [vmem:[%s453_s22 + $0x10] sm:$0xff] %v3159_v23 }
 0x4e7   : > { %3170 = vst [vmem:[%s453_s22 + $0x20] sm:$0xff] %v3161_v25  ;;  %3172 = vst [vmem:[%s453_s22 + $0x30] sm:$0xff] %v3163_v30 }
 0x4e8   : > { %3167 = vst.msk [vmem:[%s453_s22 + $0x8] sm:$0xff] %vm3166_vm1, %v3158_v50  ;;  %3169 = vst.msk [vmem:[%s453_s22 + $0x18] sm:$0xff] %vm3166_vm1, %v3160_v55 }
 0x4e9   : > { %3171 = vst.msk [vmem:[%s453_s22 + $0x28] sm:$0xff] %vm3166_vm1, %v3162_v56  ;;  %3173 = vst.msk [vmem:[%s453_s22 + $0x38] sm:$0xff] %vm3166_vm1, %v3164_v57 }
 0x4ea PF: > { %s24_s25 = sadd.s32 1, %s3644_s25   ;;  %s4396_s23 = smov %s3640_s24 }
 0x4eb   : > { %p21_p5 = scmp.ge.s32.totalorder %s24_s25, 4   ;;  %s4397_s24 = smov %s4399_s11 }
 0x4ed   :  { %23 = sbr.rel (!%p21_p5) target bundleno = 3 (0x3), region = 98 }

// kernel: reverse.1
= control target key start
LH: loop header
LB: loop body
LE: loop exit
PB: predicated region body
PF: predicated region fallthrough
CT: control target
= control target key end

     0   :  { %s344_s0 = inlined_call_operand.vmem [shape: f32[2,16,16,7], index: 0, kind: input, shape index: {}]   ;;  %s345_s1 = inlined_call_operand.vmem [shape: f32[2,16,16,7], index: 1, kind: output, shape index: {}]  }
   0x1   :  { %v112_v0 = vld [vmem:[%s344_s0 + $0x60] sm:$0xff]  ;;  %v113_v1 = vld [vmem:[%s344_s0 + $0xd0] sm:$0xff]  ;;  %v138_v14 = vld [vmem:[%s344_s0 + $0x68] sm:$0xff] }
   0x2   :  { %v115_v2 = vld [vmem:[%s344_s0 + $0x50] sm:$0xff]  ;;  %4 = vst [vmem:[%s345_s1] sm:$0xff] %v112_v0  ;;  %114 = vst [vmem:[%s345_s1 + $0x70] sm:$0xff] %v113_v1  ;;  %v117_v3 = vld [vmem:[%s344_s0 + $0xc0] sm:$0xff] }
   0x3   :  { %116 = vst [vmem:[%s345_s1 + $0x10] sm:$0xff] %v115_v2  ;;  %v119_v4 = vld [vmem:[%s344_s0 + $0x40] sm:$0xff]  ;;  %v121_v5 = vld [vmem:[%s344_s0 + $0xb0] sm:$0xff]  ;;  %118 = vst [vmem:[%s345_s1 + $0x80] sm:$0xff] %v117_v3 }
   0x4   :  { %120 = vst [vmem:[%s345_s1 + $0x20] sm:$0xff] %v119_v4  ;;  %122 = vst [vmem:[%s345_s1 + $0x90] sm:$0xff] %v121_v5  ;;  %v123_v6 = vld [vmem:[%s344_s0 + $0x30] sm:$0xff]  ;;  %v125_v7 = vld [vmem:[%s344_s0 + $0xa0] sm:$0xff] }
   0x5   :  { %v127_v8 = vld [vmem:[%s344_s0 + $0x20] sm:$0xff]  ;;  %124 = vst [vmem:[%s345_s1 + $0x30] sm:$0xff] %v123_v6  ;;  %126 = vst [vmem:[%s345_s1 + $0xa0] sm:$0xff] %v125_v7  ;;  %v129_v9 = vld [vmem:[%s344_s0 + $0x90] sm:$0xff] }
   0x6   :  { %128 = vst [vmem:[%s345_s1 + $0x40] sm:$0xff] %v127_v8  ;;  %v131_v10 = vld [vmem:[%s344_s0 + $0x10] sm:$0xff]  ;;  %v133_v11 = vld [vmem:[%s344_s0 + $0x80] sm:$0xff]  ;;  %130 = vst [vmem:[%s345_s1 + $0xb0] sm:$0xff] %v129_v9 }
   0x7   :  { %132 = vst [vmem:[%s345_s1 + $0x50] sm:$0xff] %v131_v10  ;;  %134 = vst [vmem:[%s345_s1 + $0xc0] sm:$0xff] %v133_v11  ;;  %v49_v12 = vld [vmem:[%s344_s0] sm:$0xff]  ;;  %v136_v13 = vld [vmem:[%s344_s0 + $0x70] sm:$0xff] }
   0x8   :  { %135 = vst [vmem:[%s345_s1 + $0x60] sm:$0xff] %v49_v12  ;;  %137 = vst [vmem:[%s345_s1 + $0xd0] sm:$0xff] %v136_v13  ;;  %v140_v15 = vld [vmem:[%s344_s0 + $0xd8] sm:$0xff]  ;;  %v144_v17 = vld [vmem:[%s344_s0 + $0xc8] sm:$0xff] }
   0x9   :  { %139 = vst [vmem:[%s345_s1 + $0x8] sm:$0xff] %v138_v14  ;;  %v142_v16 = vld [vmem:[%s344_s0 + $0x58] sm:$0xff]  ;;  %141 = vst [vmem:[%s345_s1 + $0x78] sm:$0xff] %v140_v15  ;;  %v146_v18 = vld [vmem:[%s344_s0 + $0x48] sm:$0xff] }
   0xa   :  { %143 = vst [vmem:[%s345_s1 + $0x18] sm:$0xff] %v142_v16  ;;  %145 = vst [vmem:[%s345_s1 + $0x88] sm:$0xff] %v144_v17  ;;  %v148_v19 = vld [vmem:[%s344_s0 + $0xb8] sm:$0xff]  ;;  %v152_v21 = vld [vmem:[%s344_s0 + $0xa8] sm:$0xff] }
   0xb   :  { %v150_v20 = vld [vmem:[%s344_s0 + $0x38] sm:$0xff]  ;;  %147 = vst [vmem:[%s345_s1 + $0x28] sm:$0xff] %v146_v18  ;;  %149 = vst [vmem:[%s345_s1 + $0x98] sm:$0xff] %v148_v19  ;;  %v154_v22 = vld [vmem:[%s344_s0 + $0x28] sm:$0xff] }
   0xc   :  { %151 = vst [vmem:[%s345_s1 + $0x38] sm:$0xff] %v150_v20  ;;  %v156_v23 = vld [vmem:[%s344_s0 + $0x98] sm:$0xff]  ;;  %153 = vst [vmem:[%s345_s1 + $0xa8] sm:$0xff] %v152_v21  ;;  %v160_v25 = vld [vmem:[%s344_s0 + $0x88] sm:$0xff] }
   0xd   :  { %155 = vst [vmem:[%s345_s1 + $0x48] sm:$0xff] %v154_v22  ;;  %157 = vst [vmem:[%s345_s1 + $0xb8] sm:$0xff] %v156_v23  ;;  %v158_v24 = vld [vmem:[%s344_s0 + $0x18] sm:$0xff]  ;;  %v162_v26 = vld [vmem:[%s344_s0 + $0x8] sm:$0xff] }
   0xe   :  { %159 = vst [vmem:[%s345_s1 + $0x58] sm:$0xff] %v158_v24  ;;  %161 = vst [vmem:[%s345_s1 + $0xc8] sm:$0xff] %v160_v25  ;;  %v164_v27 = vld [vmem:[%s344_s0 + $0x78] sm:$0xff] }
   0xf   :  { %163 = vst [vmem:[%s345_s1 + $0x68] sm:$0xff] %v162_v26  ;;  %165 = vst [vmem:[%s345_s1 + $0xd8] sm:$0xff] %v164_v27 }

// kernel: basic_layer_pallas.3
= control target key start
LH: loop header
LB: loop body
LE: loop exit
PB: predicated region body
PF: predicated region fallthrough
CT: control target
= control target key end

     0   :  { %s1339_s29 = smov 0   ;;  %s1341_s30 = smov 0   ;;  %s1428_s0 = inlined_call_operand.vmem [shape: f32[2,16,256], index: 0, kind: input, shape index: {}]   ;;  %s1429_s1 = inlined_call_operand.vmem [shape: f32[2,16,256], index: 1, kind: input, shape index: {}]   ;;  %s1430_s2 = inlined_call_operand.vmem [shape: f32[2,16,256], index: 2, kind: input, shape index: {}]   ;;  %s1431_s3 = inlined_call_operand.vmem [shape: f32[2,16,1], index: 3, kind: input, shape index: {}]   ;;  %s1432_s4 = inlined_call_operand.vmem [shape: f32[2,16], index: 4, kind: input, shape index: {}]   ;;  %s1433_s5 = inlined_call_operand.vmem [shape: f32[2,1], index: 5, kind: input, shape index: {}]   ;;  %s1434_s6 = inlined_call_operand.vmem [shape: f32[2,1], index: 6, kind: input, shape index: {}]   ;;  %s1435_s7 = inlined_call_operand.<no memory space> [shape: f32[1,1], index: 7, kind: input, shape index: {}]   ;;  %s1436_s8 = inlined_call_operand.vmem [shape: f32[2,16,256], index: 8, kind: output, shape index: {}]  }
   0x1   :  { %v13_v0 = vstv %s1435_s7  ;;  %s1343_s9 = smov 0  }
   0x2   :  { %14 = vst [vmem:[#allocation2] sm:$0x1] %v13_v0 }
   0x3 LB: > { %s32_s7 = sadd.s32 1, %s1283_s30  ;;  %p1173_p0 = scmp.ge.s32.totalorder %s1287_s9, 1  ;;  %s1287_s9 = sphi %s1343_s9, %s20_s9   ;;  %s1283_s30 = sphi %s1341_s30, %s1438_s30   ;;  %s1279_s29 = sphi %s1339_s29, %s1437_s29  }
   0x4   : > { %p34_p1 = scmp.ge.s32.totalorder %s32_s7, 2  ;;  %p329_p2 = scmp.lt.s32.totalorder %s1287_s9, 3 }
   0x6   : > { %s1440_s7 = smov (%p34_p1, %s32_s7), 0  ;;  %p330_p3 = pnand %p1173_p0, %p329_p2 }
   0x7   : > { %p395_p4 = scmp.lt.s32.totalorder (!%p330_p3), %s1279_s29, 1  ;;  %v1289_v1 = vmov (!%p330_p3), 0   ;;  %v1290_v5 = vmov (!%p330_p3), 0.0   ;;  %v460_v6 = vld [vmem:[%s1433_s5] sm:$0x3] (!%p330_p3)  ;;  %vm466_vm0 = vcmask (!%p330_p3), 130048  }
   0x8   : > { %333 = sbr.rel (%p330_p3) target bundleno = 446 (0x1be), region = 52  ;;  %1255 = vset.pattern.permute.xlu0 (!%p330_p3), %v1289_v1  ;;  %1256 = vset.pattern.permute.xlu1 (!%p330_p3), %v1289_v1  ;;  %v963_v7 = vld [vmem:[%s1434_s6] sm:$0x3] (!%p330_p3)  ;;  %vm971_vm1 = vcmask (!%p330_p3), 1041408  }
   0x9   : > { %v986_v4 = vld [vmem:[#allocation2] sm:$0x1] (!%p330_p3)  ;;  %538 = vmatprep.mubr.f32.mxu1 (!%p330_p3), %v1290_v5  ;;  %791 = vmatprep.mubr.f32.mxu0 (!%p330_p3), %v1290_v5 }
   0xa   : > { %463 = vperm.xlu1 (!%p330_p3), %1256, %v460_v6   ;;  %v459_v8 = vld [vmem:[%s1432_s4] sm:$0x3] (!%p330_p3) }
   0xb   : > { %v468_v9 = vsel (!%p330_p3), %vm466_vm0, %v459_v8, 0 }
   0xc   : > { %v1377_v10 = vand.u32 (!%p330_p3), 4294901760, %v468_v9 }
   0xe   : > { %966 = vperm.xlu1 (!%p330_p3), %1256, %v963_v7   ;;  %v540_v13 = vsub.f32 (!%p330_p3), %v468_v9, %v1377_v10 }
   0xf   : > { %s1442_s29 = smov (!%p395_p4, %s1279_s29), 1 }
  0x10   : > { %s1191_s10 = sshll.u32 %s1442_s29, 4  ;;  %s1371_s20 = sshll.u32 %s1442_s29, 5  ;;  %v541_v21 = vand.u32 4294901760, %v540_v13 }
  0x11   : > { %s428_s13 = scalar_lea.vmem %s1431_s3, %s1191_s10  ;;  %s402_s23 = scalar_lea.vmem %s1428_s0, %s1371_s20 }
  0x12   : > { %v443_v2 = vld [vmem:[%s428_s13] sm:$0xff]  ;;  %v444_v3 = vld [vmem:[%s428_s13 + $0x8] sm:$0xff]  ;;  %v441_v17 = vld [vmem:[%s402_s23 + $0x10] sm:$0xff]  ;;  %v542_v29 = vsub.f32 %v540_v13, %v541_v21  ;;  %s422_s26 = scalar_lea.vmem %s1430_s2, %s1371_s20  ;;  %s412_s29 = scalar_lea.vmem %s1429_s1, %s1371_s20 }
  0x13   : > { %447 = vperm.xlu0 %1255, %v443_v2   ;;  %v439_v11 = vld [vmem:[%s402_s23] sm:$0xff]  ;;  %v440_v12 = vld [vmem:[%s402_s23 + $0x8] sm:$0xff]  ;;  %v442_v18 = vld [vmem:[%s402_s23 + $0x18] sm:$0xff]  ;;  %v992_v2 = vlaneseq  ;;  %s437_s12 = scalar_lea.vmem %s1436_s8, %s1371_s20 }
  0x14   : > { %v543_v36 = vand.u32 4294901760, %v542_v29 }
  0x15   : > { %v993_v8 = vshrl.u32 %v992_v2, 7 }
  0x17   : > { %452 = vperm.xlu0 %1255, %v444_v3  }
  0x1b   : > { %989 = vperm.xlu0 %1255, %v986_v4  }
  0x89   : > { %v464_v53 = vpop.permute.xlu1 %463 }
  0x8d   : > { %v967_v0 = vpop.permute.xlu1 %966 }
  0x92   : > { %v448_v14 = vpop.permute.xlu0 %447 }
  0x93   : > { %v1380_v15 = vmul.f32 %v448_v14, %v439_v11  ;;  %v1382_v16 = vmul.f32 %v448_v14, %v440_v12 }
  0x95   : > { %v470_v19 = vand.u32 4294901760, %v1382_v16  ;;  %v472_v20 = vand.u32 4294901760, %v1380_v15 }
  0x96   : > { %v453_v22 = vpop.permute.xlu0 %452 }
  0x97   : > { %v1386_v23 = vmul.f32 %v453_v22, %v441_v17  ;;  %v1388_v24 = vmul.f32 %v453_v22, %v442_v18  ;;  %v551_v25 = vsub.f32 %v1382_v16, %v470_v19  ;;  %v557_v26 = vsub.f32 %v1380_v15, %v472_v20 }
  0x99   : > { %v474_v27 = vand.u32 4294901760, %v1388_v24  ;;  %v476_v28 = vand.u32 4294901760, %v1386_v23  ;;  %v552_v30 = vand.u32 4294901760, %v551_v25  ;;  %v558_v31 = vand.u32 4294901760, %v557_v26 }
  0x9a   : > { %v990_v17 = vpop.permute.xlu0 %989 }
  0x9b   : > { %v1193_v32 = vpack.c.bf16 %v474_v27, %v470_v19  ;;  %v563_v33 = vsub.f32 %v1388_v24, %v474_v27  ;;  %v1195_v34 = vpack.c.bf16 %v476_v28, %v472_v20  ;;  %v569_v35 = vsub.f32 %v1386_v23, %v476_v28 }
  0x9c   : > { %v553_v38 = vsub.f32 %v551_v25, %v552_v30  ;;  %v559_v40 = vsub.f32 %v557_v26, %v558_v31 }
  0x9d   : > { %1194 = vmatprep.subr.bf16.mxu1 %v1193_v32  ;;  %1206 = vmatprep.subr.bf16.mxu0 %v1193_v32  ;;  %v564_v37 = vand.u32 4294901760, %v563_v33  ;;  %v570_v39 = vand.u32 4294901760, %v569_v35  ;;  %v1201_v51 = vpack.c.bf16 %v563_v33, %v551_v25  ;;  %v1203_v52 = vpack.c.bf16 %v569_v35, %v557_v26 }
  0x9e   : > { %1196 = vmatpush1.bf16.msra.mxu1 %v1195_v34  ;;  %1208 = vmatpush1.bf16.msra.mxu0 %v1195_v34  ;;  %v554_v45 = vand.u32 4294901760, %v553_v38  ;;  %v560_v47 = vand.u32 4294901760, %v559_v40  ;;  %v1011_v38 = vld [vmem:[%s422_s26 + $0x8] sm:$0xff] }
  0x9f   : > { %v1209_v41 = vpack.c.bf16 %v564_v37, %v552_v30  ;;  %v565_v42 = vsub.f32 %v563_v33, %v564_v37  ;;  %v1211_v43 = vpack.c.bf16 %v570_v39, %v558_v31  ;;  %v571_v44 = vsub.f32 %v569_v35, %v570_v39  ;;  %v1010_v35 = vld [vmem:[%s422_s26] sm:$0xff]  ;;  %v1013_v39 = vld [vmem:[%s422_s26 + $0x18] sm:$0xff] }
  0xa1   : > { %544 = vmatmul.mubr.f32.vlgmr.msra.gmra.mrb[0].mxu1 %v543_v36  ;;  %795 = vmatmul.mubr.f32.vlgmr.msra.gmra.mrb[0].mxu0 %v541_v21  ;;  %v566_v46 = vand.u32 4294901760, %v565_v42  ;;  %v572_v48 = vand.u32 4294901760, %v571_v44  ;;  %v1012_v36 = vld [vmem:[%s422_s26 + $0x10] sm:$0xff]  ;;  %v1022_v42 = vld [vmem:[%s412_s29] sm:$0xff] }
  0xa2   : > { %1210 = vmatprep.subr.bf16.mxu0 %v1209_v41  ;;  %634 = vmatprep.mubr.f32.mxu1 %v1290_v5 }
  0xa3   : > { %1212 = vmatpush1.bf16.msra.mxu0 %v1211_v43  ;;  %v1197_v49 = vpack.c.bf16 %v566_v46, %v554_v45  ;;  %877 = vmatprep.mubr.f32.mxu0 %v1290_v5  ;;  %v1199_v50 = vpack.c.bf16 %v572_v48, %v560_v47  ;;  %v1024_v43 = vld [vmem:[%s412_s29 + $0x10] sm:$0xff]  ;;  %v1023_v46 = vld [vmem:[%s412_s29 + $0x8] sm:$0xff]  ;;  %v1025_v47 = vld [vmem:[%s412_s29 + $0x18] sm:$0xff] }
  0xa4   : > { %1214 = vmatprep.subr.bf16.mxu0 %v1193_v32 }
  0xa5   : > { %1198 = vmatprep.subr.bf16.mxu1 %v1197_v49 }
  0xa6   : > { %1200 = vmatpush1.bf16.msra.mxu1 %v1199_v50 }
  0xa7   : > { %1202 = vmatprep.subr.bf16.mxu1 %v1201_v51 }
  0xa9   : > { %636 = vmatmul.mubr.f32.vlgmr.msra.gmra.mrb[0].mxu1 %v1377_v10  ;;  %879 = vmatmul.mubr.f32.vlgmr.msra.gmra.mrb[0].mxu0 %v1377_v10 }
  0xaa   : > { %1216 = vmatpush1.bf16.msra.mxu0 %v1195_v34  ;;  %1204 = vmatpush1.bf16.msra.mxu1 %v1203_v52 }
  0xab   : > { %714 = vmatprep.mubr.f32.mxu1 %v1290_v5  ;;  %953 = vmatprep.mubr.f32.mxu0 %v1290_v5 }
  0xb1   : > { %717 = vmatmul.mubr.f32.vlgmr.msra.gmra.mrb[0].mxu1 %v540_v13  ;;  %955 = vmatmul.mubr.f32.vlgmr.msra.gmra.mrb[0].mxu0 %v1377_v10  ;;  %v994_v13 = vsub.s32 0, %v993_v8 }
  0xb3   : > { %v995_v21 = vrot.slane %v990_v17, %v994_v13 }
 0x184   : > { %v718_v54 = vpop.f32.mrb[0].mxu1  ;;  %v956_v55 = vpop.f32.mrb[0].mxu0 }
 0x185   : > { %v1217_v56 = vadd.f32 %v718_v54, %v464_v53  ;;  %v720_v57 = vpop.f32.mrb[1].mxu1  ;;  %v958_v58 = vpop.f32.mrb[1].mxu0 }
 0x186   : > { %v1219_v59 = vadd.f32 %v720_v57, %v464_v53 }
 0x187   : > { %v1218_v60 = vadd.f32 %v1217_v56, %v956_v55 }
 0x188   : > { %v1220_v61 = vadd.f32 %v1219_v59, %v958_v58 }
 0x189   : > { %v961_v62 = vmax.f32 %v1218_v60, 0.0 }
 0x18a   : > { %v962_v63 = vmax.f32 %v1220_v61, 0.0 }
 0x18b   : > { %v969_v1 = vmul.f32 %v967_v0, %v961_v62 }
 0x18c   : > { %v970_v3 = vmul.f32 %v967_v0, %v962_v63 }
 0x18d   : > { %v972_v4 = vsel %vm971_vm1, %v969_v1, 0.0 }
 0x18e   : > { %v973_v5 = vrot.slane %v972_v4, 4  ;;  %v979_v6 = vsel %vm971_vm1, %v970_v3, 0.0 }
 0x18f   : > { %v980_v7 = vrot.slane %v979_v6, 4 }
 0x190   : > { %v974_v9 = vadd.f32 %v973_v5, %v972_v4 }
 0x191   : > { %v981_v10 = vadd.f32 %v980_v7, %v979_v6 }
 0x192   : > { %v975_v11 = vrot.slane %v974_v9, 2 }
 0x193   : > { %v982_v12 = vrot.slane %v981_v10, 2 }
 0x194   : > { %v976_v14 = vadd.f32 %v975_v11, %v974_v9 }
 0x195   : > { %v983_v18 = vadd.f32 %v982_v12, %v981_v10 }
 0x196   : > { %v977_v19 = vrot.slane %v976_v14, 1 }
 0x197   : > { %v984_v20 = vrot.slane %v983_v18, 1 }
 0x198   : > { %v978_v22 = vadd.f32 %v977_v19, %v976_v14 }
 0x199   : > { %v985_v25 = vadd.f32 %v984_v20, %v983_v18 }
 0x19a   : > { %v996_v26 = vadd.f32 %v995_v21, %v978_v22 }
 0x19b   : > { %v997_v27 = vadd.f32 %v995_v21, %v985_v25 }
 0x19c   : > { %v1184_v28 = vmul.f32 -1.442695, %v996_v26 }
 0x19d   : > { %v1185_v29 = vmul.f32 -1.442695, %v997_v27 }
 0x19e   : > { %1257 = vpow2.f32 %v1184_v28 }
 0x19f   : > { %1259 = vpow2.f32 %v1185_v29 }
 0x1a8   : > { %v1258_v30 = vpop.eup %1257 }
 0x1a9   : > { %v1260_v31 = vpop.eup %1259  ;;  %v1004_v32 = vadd.f32 1.0, %v1258_v30 }
 0x1aa   : > { %v1005_v33 = vadd.f32 1.0, %v1260_v31 }
 0x1ab   : > { %1261 = vrcp.f32 %v1004_v32 }
 0x1ac   : > { %1263 = vrcp.f32 %v1005_v33 }
 0x1b5   : > { %v1262_v34 = vpop.eup %1261 }
 0x1b6   : > { %v1264_v37 = vpop.eup %1263  ;;  %v1014_v40 = vmul.f32 %v1262_v34, %v1380_v15  ;;  %v1016_v41 = vmul.f32 %v1262_v34, %v1386_v23 }
 0x1b7   : > { %v1015_v44 = vmul.f32 %v1264_v37, %v1382_v16  ;;  %v1017_v45 = vmul.f32 %v1264_v37, %v1388_v24 }
 0x1b8   : > { %v1018_v48 = vadd.f32 %v1014_v40, %v1010_v35  ;;  %v1020_v49 = vadd.f32 %v1016_v41, %v1012_v36 }
 0x1b9   : > { %v1019_v50 = vadd.f32 %v1015_v44, %v1011_v38  ;;  %v1021_v51 = vadd.f32 %v1017_v45, %v1013_v39 }
 0x1ba   : > { %v1026_v52 = vadd.f32 %v1022_v42, %v1018_v48  ;;  %v1028_v15 = vadd.f32 %v1024_v43, %v1020_v49 }
 0x1bb   : > { %v1027_v53 = vadd.f32 %v1023_v46, %v1019_v50  ;;  %v1029_v23 = vadd.f32 %v1025_v47, %v1021_v51 }
 0x1bc   : > { %1030 = vst [vmem:[%s437_s12] sm:$0xff] %v1026_v52  ;;  %1032 = vst [vmem:[%s437_s12 + $0x10] sm:$0xff] %v1028_v15 }
 0x1bd   : > { %1031 = vst [vmem:[%s437_s12 + $0x8] sm:$0xff] %v1027_v53  ;;  %1033 = vst [vmem:[%s437_s12 + $0x18] sm:$0xff] %v1029_v23 }
 0x1be PF: > { %s20_s9 = sadd.s32 1, %s1287_s9   ;;  %s1437_s29 = smov %s1283_s30 }
 0x1bf   : > { %p17_p5 = scmp.ge.s32.totalorder %s20_s9, 4   ;;  %s1438_s30 = smov %s1440_s7 }
 0x1c1   :  { %19 = sbr.rel (!%p17_p5) target bundleno = 3 (0x3), region = 91 }

</bundles_post_ra>
